<compile_context>
chip_gen: v6e
topology: v6e:2x2x1
jax: 0.10.0
libtpu: 0.0.40
codegen_flags: <defaults>
</compile_context>

<pallas_src>
import jax
import jax.numpy as jnp
from jax.experimental import pallas as pl
from jax.experimental.pallas import tpu as pltpu


# ----------------------------------------------------------------------------
# Kernel 1: fused decode + per-image pairwise quantities (cost, ious, fg mask)
# ----------------------------------------------------------------------------
def _pairwise_kernel(raw_ref, gtb_ref, gtoh_ref, geo_ref,
                     dec_ref, cost_ref, iou_ref, fg_ref):
    o = raw_ref[0]                           # [C5, TA]  raw head channels
    gt = gtb_ref[0]                          # [G, 4]    (cx, cy, w, h)
    oh = gtoh_ref[0]                         # [G, C]    one-hot classes (0 for pad rows)
    geo = geo_ref[...]                       # [3, TA]   (x_shift, y_shift, stride)

    s = geo[2:3, :]

    # --- fused decode (image-space boxes); single full-block store, xy/wh only ---
    xy = (o[0:2, :] + geo[0:2, :]) * s       # [2, TA]
    wh = jnp.exp(o[2:4, :]) * s              # [2, TA]
    dec_ref[0] = jnp.concatenate([xy, wh], axis=0)

    px, py = xy[0:1, :], xy[1:2, :]
    pw, ph = wh[0:1, :], wh[1:2, :]
    obj = o[4:5, :]                          # obj / cls logits stay in the raw tensor
    cls = o[5:, :]

    x_c = (geo[0:1, :] + 0.5) * s            # anchor centers in image coords
    y_c = (geo[1:2, :] + 0.5) * s

    gx = gt[:, 0:1]                          # [G, 1]
    gy = gt[:, 1:2]
    gw = gt[:, 2:3]
    gh = gt[:, 3:4]

    # --- is anchor center inside gt box ---
    b_l = x_c - (gx - 0.5 * gw)
    b_r = (gx + 0.5 * gw) - x_c
    b_t = y_c - (gy - 0.5 * gh)
    b_b = (gy + 0.5 * gh) - y_c
    in_boxes = jnp.minimum(jnp.minimum(b_l, b_t), jnp.minimum(b_r, b_b)) > 0.0

    # --- is anchor center inside fixed-radius center region ---
    r = 2.5 * s
    c_l = x_c - (gx - r)
    c_r = (gx + r) - x_c
    c_t = y_c - (gy - r)
    c_b = (gy + r) - y_c
    in_centers = jnp.minimum(jnp.minimum(c_l, c_t), jnp.minimum(c_r, c_b)) > 0.0

    in_boxes_f = in_boxes.astype(jnp.float32)                        # [G, TA]
    in_centers_f = in_centers.astype(jnp.float32)
    boxes_any = jnp.sum(in_boxes_f, axis=0, keepdims=True) > 0.0     # [1, TA]
    centers_any = jnp.sum(in_centers_f, axis=0, keepdims=True) > 0.0
    fg_f = jnp.logical_or(boxes_any, centers_any).astype(jnp.float32)
    both_f = in_boxes_f * in_centers_f                               # [G, TA]

    # --- pairwise IoU (xywh) ---
    tl_x = jnp.maximum(gx - 0.5 * gw, px - 0.5 * pw)
    tl_y = jnp.maximum(gy - 0.5 * gh, py - 0.5 * ph)
    br_x = jnp.minimum(gx + 0.5 * gw, px + 0.5 * pw)
    br_y = jnp.minimum(gy + 0.5 * gh, py + 0.5 * ph)
    en = ((tl_x < br_x) & (tl_y < br_y)).astype(jnp.float32)
    area_i = (br_x - tl_x) * (br_y - tl_y) * en
    area_a = gw * gh                                 # [G, 1]
    area_b = pw * ph                                 # [1, TA]
    iou = area_i * pl.reciprocal(area_a + area_b - area_i + 1e-16, approx=True)

    # --- pairwise classification cost: BCE(sqrt(sig_cls*sig_obj), one_hot) ---
    # log-space formulation (half the EUP passes, no -inf when sigmoid saturates);
    # clamp at -100 like PyTorch's binary_cross_entropy.
    logp = 0.5 * (jax.nn.log_sigmoid(cls) + jax.nn.log_sigmoid(obj))    # [C, TA]
    logp = jnp.maximum(logp, -100.0)
    log1mp = jnp.maximum(jnp.log1p(-jnp.exp(logp)), -100.0)
    s_term = -jnp.sum(log1mp, axis=0, keepdims=True)                    # [1, TA]
    lmat = (logp - log1mp).astype(jnp.bfloat16)                         # [C, TA]
    cls_term = jnp.dot(oh.astype(jnp.bfloat16), lmat,
                       preferred_element_type=jnp.float32)              # [G, TA] (MXU)
    pair_cls = s_term - cls_term                                        # [G, TA]

    cost = (pair_cls
            + 3.0 * (-jnp.log(iou + 1e-8))
            + 100000.0 * (1.0 - both_f)
            + 1e9 * (1.0 - fg_f))            # big penalty keeps non-fg anchors unmatched

    cost_ref[0] = cost
    iou_ref[0] = iou
    fg_ref[0] = fg_f


# ----------------------------------------------------------------------------
# Kernel 2: final loss reductions (IoU loss, BCE-with-logits obj / cls).
# Grid (B, anchor tiles); per-image lane-shaped VMEM accumulators; scalar
# reduction + output write only at the last anchor tile of each image.
# ----------------------------------------------------------------------------
def _loss_kernel(raw_ref, dec_ref, rt_ref, ct_ref, ot_ref, val_ref,
                 liou_ref, lobj_ref, lcls_ref,
                 acc_iou, acc_obj, acc_cls):
    aj = pl.program_id(1)

    @pl.when(aj == 0)
    def _init():
        acc_iou[...] = jnp.zeros_like(acc_iou)
        acc_obj[...] = jnp.zeros_like(acc_obj)
        acc_cls[...] = jnp.zeros_like(acc_cls)

    raw = raw_ref[0]       # [C5, TN] raw head logits (obj @ ch 4, cls @ ch 5:)
    bp = dec_ref[0]        # [4, TN]  decoded predicted boxes (xywh)
    rt = rt_ref[0]         # [4, TN]  matched gt boxes
    ct = ct_ref[0]         # [C, TN]  cls targets (one-hot * pred_iou)
    fg = ot_ref[0]         # [1, TN]  obj target == post-matching fg mask
    val = val_ref[...]     # [1, TN]  valid (non-padded) anchor mask

    px, py, pw, ph = bp[0:1, :], bp[1:2, :], bp[2:3, :], bp[3:4, :]
    tx, ty, tw, th = rt[0:1, :], rt[1:2, :], rt[2:3, :], rt[3:4, :]
    tl_x = jnp.maximum(px - 0.5 * pw, tx - 0.5 * tw)
    tl_y = jnp.maximum(py - 0.5 * ph, ty - 0.5 * th)
    br_x = jnp.minimum(px + 0.5 * pw, tx + 0.5 * tw)
    br_y = jnp.minimum(py + 0.5 * ph, ty + 0.5 * th)
    en = ((tl_x < br_x) & (tl_y < br_y)).astype(jnp.float32)
    area_i = (br_x - tl_x) * (br_y - tl_y) * en
    area_u = pw * ph + tw * th - area_i
    iou = area_i * pl.reciprocal(area_u + 1e-16, approx=True)
    acc_iou[...] += (1.0 - iou * iou) * fg

    def bce_logits(x, y):
        return jnp.maximum(x, 0.0) - x * y + jnp.log1p(jnp.exp(-jnp.abs(x)))

    acc_obj[...] += bce_logits(raw[4:5, :], fg) * val
    acc_cls[...] += bce_logits(raw[5:, :], ct) * fg

    @pl.when(aj == pl.num_programs(1) - 1)
    def _fin():
        liou_ref[0] = jnp.sum(acc_iou[...], axis=(0, 1), keepdims=True)
        lobj_ref[0] = jnp.sum(acc_obj[...], axis=(0, 1), keepdims=True)
        lcls_ref[0] = jnp.sum(acc_cls[...], axis=(0, 1), keepdims=True)


# ----------------------------------------------------------------------------
# Wrapper: full YOLOLoss forward
# ----------------------------------------------------------------------------
def yolo_loss(inputs, labels, num_classes, strides=(8,)):
    """inputs: list of NCHW heads [B, num_classes+5, H, W]; labels: [B, G, 5] (x,y,w,h,cls)."""
    B = inputs[0].shape[0]
    C5 = num_classes + 5

    raws, geos = [], []
    for stride, raw in zip(strides, inputs):
        _, _, H, W = raw.shape
        A_k = H * W
        raws.append(raw.reshape(B, C5, A_k).astype(jnp.float32))
        yy, xx = jnp.meshgrid(jnp.arange(H), jnp.arange(W), indexing="ij")
        grid_cm = jnp.stack([xx.reshape(-1), yy.reshape(-1)], axis=0).astype(jnp.float32)
        geos.append(jnp.concatenate(
            [grid_cm, jnp.full((1, A_k), float(stride), jnp.float32)], axis=0))
    raw_cm = jnp.concatenate(raws, axis=2)         # [B, C5, A_raw]  channel-major
    geo = jnp.concatenate(geos, axis=1)            # [3, A_raw]
    A_raw = raw_cm.shape[2]

    # --- pad anchor axis to a multiple of the lane tile TA (multiple of 128) ---
    TA = min(1024, ((A_raw + 127) // 128) * 128)   # 1024 fits v7x's smaller VMEM too
    A = ((A_raw + TA - 1) // TA) * TA
    if A != A_raw:
        pad = A - A_raw
        raw_cm = jnp.pad(raw_cm, ((0, 0), (0, 0), (0, pad)))
        geo_pad = jnp.concatenate([jnp.full((2, pad), -1e4, jnp.float32),
                                   jnp.ones((1, pad), jnp.float32)], axis=0)
        geo = jnp.concatenate([geo, geo_pad], axis=1)
    anchor_valid = (jnp.arange(A) < A_raw).astype(jnp.float32)      # [A]

    # --- pad GT slots to a multiple of 8 (sublane alignment / MXU shape) ---
    gt_boxes = labels[..., :4].astype(jnp.float32)                  # [B, G, 4]
    gt_classes = labels[..., 4].astype(jnp.int32)                   # [B, G]
    G = gt_boxes.shape[1]
    G_pad = max(8, ((G + 7) // 8) * 8)
    if G_pad != G:
        pad_boxes = jnp.concatenate(
            [jnp.full((B, G_pad - G, 2), 1e8, jnp.float32),         # far away, zero size
             jnp.zeros((B, G_pad - G, 2), jnp.float32)], axis=-1)
        gt_boxes = jnp.concatenate([gt_boxes, pad_boxes], axis=1)
        gt_classes = jnp.concatenate(
            [gt_classes, jnp.zeros((B, G_pad - G), jnp.int32)], axis=1)
    gt_valid = (jnp.arange(G_pad) < G).astype(jnp.float32)          # [G_pad]
    gt_oh = (jax.nn.one_hot(gt_classes, num_classes, dtype=jnp.float32)
             * gt_valid[None, :, None])                             # [B, G_pad, C]

    cost_est = pl.CostEstimate(
        flops=int(B * A * (2 * G_pad * num_classes + 64 * G_pad + 16 * C5)),
        transcendentals=int(B * A * (4 * num_classes + 4)),
        bytes_accessed=int(4 * B * A * (C5 + 2 * G_pad + 4 + 1)
                           + 4 * (3 * A + B * G_pad * (4 + num_classes))))

    dec, cost, ious, fgm = pl.pallas_call(
        _pairwise_kernel,
        out_shape=(jax.ShapeDtypeStruct((B, 4, A), jnp.float32),     # decoded xywh only
                   jax.ShapeDtypeStruct((B, G_pad, A), jnp.float32),
                   jax.ShapeDtypeStruct((B, G_pad, A), jnp.float32),
                   jax.ShapeDtypeStruct((B, 1, A), jnp.float32)),
        grid=(B, A // TA),
        in_specs=[pl.BlockSpec((1, C5, TA), lambda b, a: (b, 0, a)),
                  pl.BlockSpec((1, G_pad, 4), lambda b, a: (b, 0, 0)),
                  pl.BlockSpec((1, G_pad, num_classes), lambda b, a: (b, 0, 0)),
                  pl.BlockSpec((3, TA), lambda b, a: (0, a))],
        out_specs=(pl.BlockSpec((1, 4, TA), lambda b, a: (b, 0, a)),
                   pl.BlockSpec((1, G_pad, TA), lambda b, a: (b, 0, a)),
                   pl.BlockSpec((1, G_pad, TA), lambda b, a: (b, 0, a)),
                   pl.BlockSpec((1, 1, TA), lambda b, a: (b, 0, a))),
        compiler_params=pltpu.CompilerParams(
            dimension_semantics=("parallel", "parallel")),
        cost_estimate=cost_est,
    )(raw_cm, gt_boxes, gt_oh, geo)

    # TODO(synk): dynamic-k SimOTA matching (data-dependent top-k / dedup / gathers) has no
    # clean Pallas equivalent; done in plain JAX with static shapes + masking (semantically
    # equivalent on fg anchors), vmapped over batch.  One lax.top_k(k=10) per GT row replaces
    # the former two full argsorts over the anchor axis.
    n_cand = min(10, A)

    def match_one(cst, iou_b, fg_b, gt_box, gt_oh_b):
        fg_bool = fg_b > 0.5
        iou_m = jnp.where(fg_bool[None, :], iou_b, 0.0)
        topk_ious, _ = jax.lax.top_k(iou_m, n_cand)                          # [G, 10]
        dynamic_ks = jnp.where(
            gt_valid > 0.5,
            jnp.maximum(jnp.sum(topk_ious, axis=1).astype(jnp.int32), 1), 0)  # [G]
        # k-th smallest cost per GT row (the 10 smallest costs, ascending)
        neg_top, _ = jax.lax.top_k(-cst, n_cand)                             # [G, 10]
        kth = -jnp.take_along_axis(
            neg_top, jnp.clip(dynamic_ks - 1, 0, n_cand - 1)[:, None], axis=1)  # [G, 1]
        matching = ((cst <= kth) & (dynamic_ks > 0)[:, None]
                    & fg_bool[None, :]).astype(jnp.float32)                  # [G, A]
        # anchors matched to >1 GT keep only the min-cost (valid) GT
        multi = jnp.sum(matching, axis=0) > 1.0
        cst_v = jnp.where(gt_valid[:, None] > 0.5, cst, 1e30)
        cost_argmin = jnp.argmin(cst_v, axis=0)
        dedup = (jnp.arange(G_pad)[:, None] == cost_argmin[None, :]).astype(jnp.float32)
        matching = jnp.where(multi[None, :], dedup, matching)
        matching = matching * fg_b[None, :]                                  # fg anchors only
        fg_inb = jnp.sum(matching, axis=0) > 0.0                             # [A]
        num_fg_b = jnp.sum(fg_inb.astype(jnp.float32))
        matched_gt = jnp.argmax(matching, axis=0)                            # [A]
        pred_iou = jnp.sum(matching * iou_b, axis=0)                         # [A]
        # channel-major targets: no HBM relayout transposes downstream
        reg_t = jnp.take(gt_box.T, matched_gt, axis=1)                       # [4, A]
        cls_t = jnp.take(gt_oh_b.T, matched_gt, axis=1) * pred_iou[None, :]  # [C, A]
        obj_t = fg_inb.astype(jnp.float32)[None, :]                          # [1, A]
        return reg_t, cls_t, obj_t, num_fg_b

    reg_t, cls_t, obj_t, num_fg_b = jax.vmap(match_one)(
        cost, ious, fgm[:, 0], gt_boxes, gt_oh)
    num_fg = jnp.maximum(jnp.sum(num_fg_b), 1.0)

    TN = TA
    liou, lobj, lcls = pl.pallas_call(
        _loss_kernel,
        out_shape=(jax.ShapeDtypeStruct((B, 1, 1), jnp.float32),) * 3,
        grid=(B, A // TN),
        in_specs=[pl.BlockSpec((1, C5, TN), lambda b, a: (b, 0, a)),          # raw logits
                  pl.BlockSpec((1, 4, TN), lambda b, a: (b, 0, a)),           # decoded boxes
                  pl.BlockSpec((1, 4, TN), lambda b, a: (b, 0, a)),           # reg targets
                  pl.BlockSpec((1, num_classes, TN), lambda b, a: (b, 0, a)),  # cls targets
                  pl.BlockSpec((1, 1, TN), lambda b, a: (b, 0, a)),           # obj tgt / fg
                  pl.BlockSpec((1, TN), lambda b, a: (0, a))],                # anchor valid
        out_specs=(pl.BlockSpec((1, 1, 1), lambda b, a: (b, 0, 0)),) * 3,
        scratch_shapes=[pltpu.VMEM((1, TN), jnp.float32),
                        pltpu.VMEM((1, TN), jnp.float32),
                        pltpu.VMEM((num_classes, TN), jnp.float32)],
        compiler_params=pltpu.CompilerParams(
            dimension_semantics=("parallel", "arbitrary")),
    )(raw_cm, dec, reg_t, cls_t, obj_t, anchor_valid[None, :])

    reg_weight = 5.0
    loss = (reg_weight * jnp.sum(liou) + jnp.sum(lobj) + jnp.sum(lcls)) / num_fg
    return loss


if __name__ == "__main__":
    key = jax.random.PRNGKey(0)
    B, num_classes, H, W, G = 2, 4, 16, 16, 5
    stride = 8
    C5 = num_classes + 5

    k1, k2, k3, k4 = jax.random.split(key, 4)
    raw = jax.random.normal(k1, (B, C5, H, W), jnp.float32)            # NCHW head output
    centers = jax.random.uniform(k2, (B, G, 2), jnp.float32, 30.0, 98.0)
    sizes = jax.random.uniform(k3, (B, G, 2), jnp.float32, 24.0, 56.0)
    classes = jax.random.randint(k4, (B, G), 0, num_classes).astype(jnp.float32)
    labels = jnp.concatenate([centers, sizes, classes[..., None]], axis=-1)  # [B, G, 5]

    @jax.jit
    def loss_fn(r, l):
        return yolo_loss([r], l, num_classes, strides=(stride,))

    loss = loss_fn(raw, labels)
    jax.block_until_ready(loss)
    print("KERNEL_OK")
</pallas_src>

<mosaic_0001>
module attributes {stable_mosaic.version = 11 : i64} {
  func.func @_pairwise_kernel(%arg0: i32, %arg1: i32, %arg2: memref<1x9x256xf32, #tpu.memory_space<vmem>>, %arg3: memref<1x8x4xf32, #tpu.memory_space<vmem>>, %arg4: memref<1x8x4xf32, #tpu.memory_space<vmem>>, %arg5: memref<3x256xf32, #tpu.memory_space<vmem>>, %arg6: memref<1x4x256xf32, #tpu.memory_space<vmem>>, %arg7: memref<1x8x256xf32, #tpu.memory_space<vmem>>, %arg8: memref<1x8x256xf32, #tpu.memory_space<vmem>>, %arg9: memref<1x1x256xf32, #tpu.memory_space<vmem>>) attributes {dimension_semantics = [#tpu.dimension_semantics<parallel>, #tpu.dimension_semantics<parallel>], iteration_bounds = array<i64: 2, 1>, scalar_prefetch = 0 : i64, scratch_operands = 0 : i64, tpu.core_type = #tpu.core_type<tc>, window_params = [{transform_indices = @transform_0, window_bounds = array<i64: 1, 9, 256>}, {transform_indices = @transform_1, window_bounds = array<i64: 1, 8, 4>}, {transform_indices = @transform_2, window_bounds = array<i64: 1, 8, 4>}, {transform_indices = @transform_3, window_bounds = array<i64: 3, 256>}, {transform_indices = @transform_4, window_bounds = array<i64: 1, 4, 256>}, {transform_indices = @transform_5, window_bounds = array<i64: 1, 8, 256>}, {transform_indices = @transform_6, window_bounds = array<i64: 1, 8, 256>}, {transform_indices = @transform_7, window_bounds = array<i64: 1, 1, 256>}]} {
    %c0 = arith.constant 0 : index
    %c0_0 = arith.constant 0 : index
    %c0_1 = arith.constant 0 : index
    %0 = vector.load %arg2[%c0, %c0_0, %c0_1] : memref<1x9x256xf32, #tpu.memory_space<vmem>>, vector<1x9x256xf32>
    %1 = vector.shape_cast %0 : vector<1x9x256xf32> to vector<9x256xf32>
    %c0_2 = arith.constant 0 : index
    %c0_3 = arith.constant 0 : index
    %c0_4 = arith.constant 0 : index
    %2 = vector.load %arg3[%c0_2, %c0_3, %c0_4] : memref<1x8x4xf32, #tpu.memory_space<vmem>>, vector<1x8x4xf32>
    %3 = vector.shape_cast %2 : vector<1x8x4xf32> to vector<8x4xf32>
    %c0_5 = arith.constant 0 : index
    %c0_6 = arith.constant 0 : index
    %c0_7 = arith.constant 0 : index
    %4 = vector.load %arg4[%c0_5, %c0_6, %c0_7] : memref<1x8x4xf32, #tpu.memory_space<vmem>>, vector<1x8x4xf32>
    %5 = vector.shape_cast %4 : vector<1x8x4xf32> to vector<8x4xf32>
    %c0_8 = arith.constant 0 : index
    %c0_9 = arith.constant 0 : index
    %6 = vector.load %arg5[%c0_8, %c0_9] : memref<3x256xf32, #tpu.memory_space<vmem>>, vector<3x256xf32>
    %7 = vector.extract_strided_slice %6 {offsets = [2, 0], sizes = [1, 256], strides = [1, 1]} : vector<3x256xf32> to vector<1x256xf32>
    %8 = vector.extract_strided_slice %1 {offsets = [0, 0], sizes = [2, 256], strides = [1, 1]} : vector<9x256xf32> to vector<2x256xf32>
    %9 = vector.extract_strided_slice %6 {offsets = [0, 0], sizes = [2, 256], strides = [1, 1]} : vector<3x256xf32> to vector<2x256xf32>
    %10 = arith.addf %8, %9 : vector<2x256xf32>
    %11 = vector.broadcast %7 : vector<1x256xf32> to vector<2x256xf32>
    %12 = arith.mulf %10, %11 : vector<2x256xf32>
    %13 = vector.extract_strided_slice %1 {offsets = [2, 0], sizes = [2, 256], strides = [1, 1]} : vector<9x256xf32> to vector<2x256xf32>
    %14 = math.exp %13 : vector<2x256xf32>
    %15 = vector.broadcast %7 : vector<1x256xf32> to vector<2x256xf32>
    %16 = arith.mulf %14, %15 : vector<2x256xf32>
    %17 = tpu.concatenate %12, %16 in 0 : vector<2x256xf32>, vector<2x256xf32> -> vector<4x256xf32>
    %c0_10 = arith.constant 0 : index
    %c0_11 = arith.constant 0 : index
    %c0_12 = arith.constant 0 : index
    %18 = vector.load %arg6[%c0_10, %c0_11, %c0_12] : memref<1x4x256xf32, #tpu.memory_space<vmem>>, vector<1x4x256xf32>
    %19 = vector.shape_cast %18 : vector<1x4x256xf32> to vector<4x256xf32>
    %20 = vector.shape_cast %17 : vector<4x256xf32> to vector<1x4x256xf32>
    tpu.vector_store %arg6[%c0_10, %c0_11, %c0_12], %20 {strides = array<i32>} : memref<1x4x256xf32, #tpu.memory_space<vmem>>, vector<1x4x256xf32>,
    %21 = vector.extract_strided_slice %12 {offsets = [0, 0], sizes = [1, 256], strides = [1, 1]} : vector<2x256xf32> to vector<1x256xf32>
    %22 = vector.extract_strided_slice %12 {offsets = [1, 0], sizes = [1, 256], strides = [1, 1]} : vector<2x256xf32> to vector<1x256xf32>
    %23 = vector.extract_strided_slice %16 {offsets = [0, 0], sizes = [1, 256], strides = [1, 1]} : vector<2x256xf32> to vector<1x256xf32>
    %24 = vector.extract_strided_slice %16 {offsets = [1, 0], sizes = [1, 256], strides = [1, 1]} : vector<2x256xf32> to vector<1x256xf32>
    %25 = vector.extract_strided_slice %1 {offsets = [4, 0], sizes = [1, 256], strides = [1, 1]} : vector<9x256xf32> to vector<1x256xf32>
    %26 = vector.extract_strided_slice %1 {offsets = [5, 0], sizes = [4, 256], strides = [1, 1]} : vector<9x256xf32> to vector<4x256xf32>
    %27 = vector.extract_strided_slice %6 {offsets = [0, 0], sizes = [1, 256], strides = [1, 1]} : vector<3x256xf32> to vector<1x256xf32>
    %cst = arith.constant 5.000000e-01 : f32
    %28 = vector.broadcast %cst : f32 to vector<1x256xf32>
    %29 = arith.addf %27, %28 : vector<1x256xf32>
    %30 = arith.mulf %29, %7 : vector<1x256xf32>
    %31 = vector.extract_strided_slice %6 {offsets = [1, 0], sizes = [1, 256], strides = [1, 1]} : vector<3x256xf32> to vector<1x256xf32>
    %cst_13 = arith.constant 5.000000e-01 : f32
    %32 = vector.broadcast %cst_13 : f32 to vector<1x256xf32>
    %33 = arith.addf %31, %32 : vector<1x256xf32>
    %34 = arith.mulf %33, %7 : vector<1x256xf32>
    %35 = vector.extract_strided_slice %3 {offsets = [0, 0], sizes = [8, 1], strides = [1, 1]} : vector<8x4xf32> to vector<8x1xf32>
    %36 = vector.extract_strided_slice %3 {offsets = [0, 1], sizes = [8, 1], strides = [1, 1]} : vector<8x4xf32> to vector<8x1xf32>
    %37 = vector.extract_strided_slice %3 {offsets = [0, 2], sizes = [8, 1], strides = [1, 1]} : vector<8x4xf32> to vector<8x1xf32>
    %38 = vector.extract_strided_slice %3 {offsets = [0, 3], sizes = [8, 1], strides = [1, 1]} : vector<8x4xf32> to vector<8x1xf32>
    %cst_14 = arith.constant 5.000000e-01 : f32
    %39 = vector.broadcast %cst_14 : f32 to vector<8x1xf32>
    %40 = arith.mulf %39, %37 : vector<8x1xf32>
    %41 = arith.subf %35, %40 : vector<8x1xf32>
    %42 = vector.broadcast %30 : vector<1x256xf32> to vector<8x256xf32>
    %43 = vector.broadcast %41 : vector<8x1xf32> to vector<8x256xf32>
    %44 = arith.subf %42, %43 : vector<8x256xf32>
    %cst_15 = arith.constant 5.000000e-01 : f32
    %45 = vector.broadcast %cst_15 : f32 to vector<8x1xf32>
    %46 = arith.mulf %45, %37 : vector<8x1xf32>
    %47 = arith.addf %35, %46 : vector<8x1xf32>
    %48 = vector.broadcast %47 : vector<8x1xf32> to vector<8x256xf32>
    %49 = vector.broadcast %30 : vector<1x256xf32> to vector<8x256xf32>
    %50 = arith.subf %48, %49 : vector<8x256xf32>
    %cst_16 = arith.constant 5.000000e-01 : f32
    %51 = vector.broadcast %cst_16 : f32 to vector<8x1xf32>
    %52 = arith.mulf %51, %38 : vector<8x1xf32>
    %53 = arith.subf %36, %52 : vector<8x1xf32>
    %54 = vector.broadcast %34 : vector<1x256xf32> to vector<8x256xf32>
    %55 = vector.broadcast %53 : vector<8x1xf32> to vector<8x256xf32>
    %56 = arith.subf %54, %55 : vector<8x256xf32>
    %cst_17 = arith.constant 5.000000e-01 : f32
    %57 = vector.broadcast %cst_17 : f32 to vector<8x1xf32>
    %58 = arith.mulf %57, %38 : vector<8x1xf32>
    %59 = arith.addf %36, %58 : vector<8x1xf32>
    %60 = vector.broadcast %59 : vector<8x1xf32> to vector<8x256xf32>
    %61 = vector.broadcast %34 : vector<1x256xf32> to vector<8x256xf32>
    %62 = arith.subf %60, %61 : vector<8x256xf32>
    %63 = arith.minimumf %44, %56 : vector<8x256xf32>
    %64 = arith.minimumf %50, %62 : vector<8x256xf32>
    %65 = arith.minimumf %63, %64 : vector<8x256xf32>
    %cst_18 = arith.constant 0.000000e+00 : f32
    %66 = vector.broadcast %cst_18 : f32 to vector<8x256xf32>
    %67 = arith.cmpf ogt, %65, %66 : vector<8x256xf32>
    %cst_19 = arith.constant 2.500000e+00 : f32
    %68 = vector.broadcast %cst_19 : f32 to vector<1x256xf32>
    %69 = arith.mulf %68, %7 : vector<1x256xf32>
    %70 = vector.broadcast %35 : vector<8x1xf32> to vector<8x256xf32>
    %71 = vector.broadcast %69 : vector<1x256xf32> to vector<8x256xf32>
    %72 = arith.subf %70, %71 : vector<8x256xf32>
    %73 = vector.broadcast %30 : vector<1x256xf32> to vector<8x256xf32>
    %74 = arith.subf %73, %72 : vector<8x256xf32>
    %75 = vector.broadcast %35 : vector<8x1xf32> to vector<8x256xf32>
    %76 = vector.broadcast %69 : vector<1x256xf32> to vector<8x256xf32>
    %77 = arith.addf %75, %76 : vector<8x256xf32>
    %78 = vector.broadcast %30 : vector<1x256xf32> to vector<8x256xf32>
    %79 = arith.subf %77, %78 : vector<8x256xf32>
    %80 = vector.broadcast %36 : vector<8x1xf32> to vector<8x256xf32>
    %81 = vector.broadcast %69 : vector<1x256xf32> to vector<8x256xf32>
    %82 = arith.subf %80, %81 : vector<8x256xf32>
    %83 = vector.broadcast %34 : vector<1x256xf32> to vector<8x256xf32>
    %84 = arith.subf %83, %82 : vector<8x256xf32>
    %85 = vector.broadcast %36 : vector<8x1xf32> to vector<8x256xf32>
    %86 = vector.broadcast %69 : vector<1x256xf32> to vector<8x256xf32>
    %87 = arith.addf %85, %86 : vector<8x256xf32>
    %88 = vector.broadcast %34 : vector<1x256xf32> to vector<8x256xf32>
    %89 = arith.subf %87, %88 : vector<8x256xf32>
    %90 = arith.minimumf %74, %84 : vector<8x256xf32>
    %91 = arith.minimumf %79, %89 : vector<8x256xf32>
    %92 = arith.minimumf %90, %91 : vector<8x256xf32>
    %cst_20 = arith.constant 0.000000e+00 : f32
    %93 = vector.broadcast %cst_20 : f32 to vector<8x256xf32>
    %94 = arith.cmpf ogt, %92, %93 : vector<8x256xf32>
    %95 = arith.extui %67 : vector<8x256xi1> to vector<8x256xi32>
    %96 = arith.sitofp %95 : vector<8x256xi32> to vector<8x256xf32>
    %97 = arith.extui %94 : vector<8x256xi1> to vector<8x256xi32>
    %98 = arith.sitofp %97 : vector<8x256xi32> to vector<8x256xf32>
    %cst_21 = arith.constant dense<0.000000e+00> : vector<256xf32>
    %99 = vector.multi_reduction <add>, %96, %cst_21 [0] : vector<8x256xf32> to vector<256xf32>
    %100 = vector.shape_cast %99 : vector<256xf32> to vector<1x256xf32>
    %cst_22 = arith.constant 0.000000e+00 : f32
    %101 = vector.broadcast %cst_22 : f32 to vector<1x256xf32>
    %102 = arith.cmpf ogt, %100, %101 : vector<1x256xf32>
    %cst_23 = arith.constant dense<0.000000e+00> : vector<256xf32>
    %103 = vector.multi_reduction <add>, %98, %cst_23 [0] : vector<8x256xf32> to vector<256xf32>
    %104 = vector.shape_cast %103 : vector<256xf32> to vector<1x256xf32>
    %cst_24 = arith.constant 0.000000e+00 : f32
    %105 = vector.broadcast %cst_24 : f32 to vector<1x256xf32>
    %106 = arith.cmpf ogt, %104, %105 : vector<1x256xf32>
    %107 = arith.ori %102, %106 : vector<1x256xi1>
    %108 = arith.extui %107 : vector<1x256xi1> to vector<1x256xi32>
    %109 = arith.sitofp %108 : vector<1x256xi32> to vector<1x256xf32>
    %110 = arith.mulf %96, %98 : vector<8x256xf32>
    %cst_25 = arith.constant 5.000000e-01 : f32
    %111 = vector.broadcast %cst_25 : f32 to vector<8x1xf32>
    %112 = arith.mulf %111, %37 : vector<8x1xf32>
    %113 = arith.subf %35, %112 : vector<8x1xf32>
    %cst_26 = arith.constant 5.000000e-01 : f32
    %114 = vector.broadcast %cst_26 : f32 to vector<1x256xf32>
    %115 = arith.mulf %114, %23 : vector<1x256xf32>
    %116 = arith.subf %21, %115 : vector<1x256xf32>
    %117 = vector.broadcast %113 : vector<8x1xf32> to vector<8x256xf32>
    %118 = vector.broadcast %116 : vector<1x256xf32> to vector<8x256xf32>
    %119 = arith.maximumf %117, %118 : vector<8x256xf32>
    %cst_27 = arith.constant 5.000000e-01 : f32
    %120 = vector.broadcast %cst_27 : f32 to vector<8x1xf32>
    %121 = arith.mulf %120, %38 : vector<8x1xf32>
    %122 = arith.subf %36, %121 : vector<8x1xf32>
    %cst_28 = arith.constant 5.000000e-01 : f32
    %123 = vector.broadcast %cst_28 : f32 to vector<1x256xf32>
    %124 = arith.mulf %123, %24 : vector<1x256xf32>
    %125 = arith.subf %22, %124 : vector<1x256xf32>
    %126 = vector.broadcast %122 : vector<8x1xf32> to vector<8x256xf32>
    %127 = vector.broadcast %125 : vector<1x256xf32> to vector<8x256xf32>
    %128 = arith.maximumf %126, %127 : vector<8x256xf32>
    %cst_29 = arith.constant 5.000000e-01 : f32
    %129 = vector.broadcast %cst_29 : f32 to vector<8x1xf32>
    %130 = arith.mulf %129, %37 : vector<8x1xf32>
    %131 = arith.addf %35, %130 : vector<8x1xf32>
    %cst_30 = arith.constant 5.000000e-01 : f32
    %132 = vector.broadcast %cst_30 : f32 to vector<1x256xf32>
    %133 = arith.mulf %132, %23 : vector<1x256xf32>
    %134 = arith.addf %21, %133 : vector<1x256xf32>
    %135 = vector.broadcast %131 : vector<8x1xf32> to vector<8x256xf32>
    %136 = vector.broadcast %134 : vector<1x256xf32> to vector<8x256xf32>
    %137 = arith.minimumf %135, %136 : vector<8x256xf32>
    %cst_31 = arith.constant 5.000000e-01 : f32
    %138 = vector.broadcast %cst_31 : f32 to vector<8x1xf32>
    %139 = arith.mulf %138, %38 : vector<8x1xf32>
    %140 = arith.addf %36, %139 : vector<8x1xf32>
    %cst_32 = arith.constant 5.000000e-01 : f32
    %141 = vector.broadcast %cst_32 : f32 to vector<1x256xf32>
    %142 = arith.mulf %141, %24 : vector<1x256xf32>
    %143 = arith.addf %22, %142 : vector<1x256xf32>
    %144 = vector.broadcast %140 : vector<8x1xf32> to vector<8x256xf32>
    %145 = vector.broadcast %143 : vector<1x256xf32> to vector<8x256xf32>
    %146 = arith.minimumf %144, %145 : vector<8x256xf32>
    %147 = arith.cmpf olt, %119, %137 : vector<8x256xf32>
    %148 = arith.cmpf olt, %128, %146 : vector<8x256xf32>
    %149 = arith.andi %147, %148 : vector<8x256xi1>
    %150 = arith.extui %149 : vector<8x256xi1> to vector<8x256xi32>
    %151 = arith.sitofp %150 : vector<8x256xi32> to vector<8x256xf32>
    %152 = arith.subf %137, %119 : vector<8x256xf32>
    %153 = arith.subf %146, %128 : vector<8x256xf32>
    %154 = arith.mulf %152, %153 : vector<8x256xf32>
    %155 = arith.mulf %154, %151 : vector<8x256xf32>
    %156 = arith.mulf %37, %38 : vector<8x1xf32>
    %157 = arith.mulf %23, %24 : vector<1x256xf32>
    %158 = vector.broadcast %156 : vector<8x1xf32> to vector<8x256xf32>
    %159 = vector.broadcast %157 : vector<1x256xf32> to vector<8x256xf32>
    %160 = arith.addf %158, %159 : vector<8x256xf32>
    %161 = arith.subf %160, %155 : vector<8x256xf32>
    %cst_33 = arith.constant 1.000000e-16 : f32
    %162 = vector.broadcast %cst_33 : f32 to vector<8x256xf32>
    %163 = arith.addf %161, %162 : vector<8x256xf32>
    %164 = tpu.reciprocal %163 {approx = true} : vector<8x256xf32> -> vector<8x256xf32>
    %165 = arith.mulf %155, %164 : vector<8x256xf32>
    %cst_34 = arith.constant 0.000000e+00 : f32
    %166 = vector.broadcast %cst_34 : f32 to vector<4x256xf32>
    %167 = arith.subf %166, %26 : vector<4x256xf32>
    %cst_35 = arith.constant 0.000000e+00 : f32
    %168 = vector.broadcast %cst_35 : f32 to vector<4x256xf32>
    %169 = arith.maximumf %167, %168 : vector<4x256xf32>
    %170 = vector.broadcast %cst_35 : f32 to vector<4x256xf32>
    %171 = arith.subf %167, %170 : vector<4x256xf32>
    %172 = arith.cmpf one, %171, %171 : vector<4x256xf32>
    %173 = vector.broadcast %cst_35 : f32 to vector<4x256xf32>
    %174 = arith.addf %167, %173 : vector<4x256xf32>
    %175 = math.absf %171 : vector<4x256xf32>
    %cst_36 = arith.constant 0.000000e+00 : f32
    %176 = vector.broadcast %cst_36 : f32 to vector<4x256xf32>
    %177 = arith.subf %176, %175 : vector<4x256xf32>
    %178 = math.exp %177 : vector<4x256xf32>
    %179 = math.log1p %178 : vector<4x256xf32>
    %180 = arith.addf %169, %179 : vector<4x256xf32>
    %181 = arith.select %172, %174, %180 : vector<4x256xi1>, vector<4x256xf32>
    %cst_37 = arith.constant 0.000000e+00 : f32
    %182 = vector.broadcast %cst_37 : f32 to vector<4x256xf32>
    %183 = arith.subf %182, %181 : vector<4x256xf32>
    %cst_38 = arith.constant 0.000000e+00 : f32
    %184 = vector.broadcast %cst_38 : f32 to vector<1x256xf32>
    %185 = arith.subf %184, %25 : vector<1x256xf32>
    %cst_39 = arith.constant 0.000000e+00 : f32
    %186 = vector.broadcast %cst_39 : f32 to vector<1x256xf32>
    %187 = arith.maximumf %185, %186 : vector<1x256xf32>
    %188 = vector.broadcast %cst_39 : f32 to vector<1x256xf32>
    %189 = arith.subf %185, %188 : vector<1x256xf32>
    %190 = arith.cmpf one, %189, %189 : vector<1x256xf32>
    %191 = vector.broadcast %cst_39 : f32 to vector<1x256xf32>
    %192 = arith.addf %185, %191 : vector<1x256xf32>
    %193 = math.absf %189 : vector<1x256xf32>
    %cst_40 = arith.constant 0.000000e+00 : f32
    %194 = vector.broadcast %cst_40 : f32 to vector<1x256xf32>
    %195 = arith.subf %194, %193 : vector<1x256xf32>
    %196 = math.exp %195 : vector<1x256xf32>
    %197 = math.log1p %196 : vector<1x256xf32>
    %198 = arith.addf %187, %197 : vector<1x256xf32>
    %199 = arith.select %190, %192, %198 : vector<1x256xi1>, vector<1x256xf32>
    %cst_41 = arith.constant 0.000000e+00 : f32
    %200 = vector.broadcast %cst_41 : f32 to vector<1x256xf32>
    %201 = arith.subf %200, %199 : vector<1x256xf32>
    %202 = vector.broadcast %201 : vector<1x256xf32> to vector<4x256xf32>
    %203 = arith.addf %183, %202 : vector<4x256xf32>
    %cst_42 = arith.constant 5.000000e-01 : f32
    %204 = vector.broadcast %cst_42 : f32 to vector<4x256xf32>
    %205 = arith.mulf %204, %203 : vector<4x256xf32>
    %cst_43 = arith.constant -1.000000e+02 : f32
    %206 = vector.broadcast %cst_43 : f32 to vector<4x256xf32>
    %207 = arith.maximumf %205, %206 : vector<4x256xf32>
    %208 = math.exp %207 : vector<4x256xf32>
    %cst_44 = arith.constant 0.000000e+00 : f32
    %209 = vector.broadcast %cst_44 : f32 to vector<4x256xf32>
    %210 = arith.subf %209, %208 : vector<4x256xf32>
    %211 = math.log1p %210 : vector<4x256xf32>
    %cst_45 = arith.constant -1.000000e+02 : f32
    %212 = vector.broadcast %cst_45 : f32 to vector<4x256xf32>
    %213 = arith.maximumf %211, %212 : vector<4x256xf32>
    %cst_46 = arith.constant dense<0.000000e+00> : vector<256xf32>
    %214 = vector.multi_reduction <add>, %213, %cst_46 [0] : vector<4x256xf32> to vector<256xf32>
    %215 = vector.shape_cast %214 : vector<256xf32> to vector<1x256xf32>
    %cst_47 = arith.constant 0.000000e+00 : f32
    %216 = vector.broadcast %cst_47 : f32 to vector<1x256xf32>
    %217 = arith.subf %216, %215 : vector<1x256xf32>
    %218 = arith.subf %207, %213 : vector<4x256xf32>
    %219 = arith.truncf %218 : vector<4x256xf32> to vector<4x256xbf16>
    %220 = arith.truncf %5 : vector<8x4xf32> to vector<8x4xbf16>
    %cst_48 = arith.constant dense<0.000000e+00> : vector<8x256xf32>
    %221 = tpu.matmul %220, %219, %cst_48 {dimension_numbers = #tpu.dot_dimension_numbers<[1], [0], [0], [1], [0, 0, 1, 1], [], []>} : vector<8x4xbf16>, vector<4x256xbf16>, vector<8x256xf32> -> vector<8x256xf32>
    %222 = vector.broadcast %217 : vector<1x256xf32> to vector<8x256xf32>
    %223 = arith.subf %222, %221 : vector<8x256xf32>
    %cst_49 = arith.constant 9.99999993E-9 : f32
    %224 = vector.broadcast %cst_49 : f32 to vector<8x256xf32>
    %225 = arith.addf %165, %224 : vector<8x256xf32>
    %226 = math.log %225 : vector<8x256xf32>
    %cst_50 = arith.constant 0.000000e+00 : f32
    %227 = vector.broadcast %cst_50 : f32 to vector<8x256xf32>
    %228 = arith.subf %227, %226 : vector<8x256xf32>
    %cst_51 = arith.constant 3.000000e+00 : f32
    %229 = vector.broadcast %cst_51 : f32 to vector<8x256xf32>
    %230 = arith.mulf %229, %228 : vector<8x256xf32>
    %231 = arith.addf %223, %230 : vector<8x256xf32>
    %cst_52 = arith.constant 1.000000e+00 : f32
    %232 = vector.broadcast %cst_52 : f32 to vector<8x256xf32>
    %233 = arith.subf %232, %110 : vector<8x256xf32>
    %cst_53 = arith.constant 1.000000e+05 : f32
    %234 = vector.broadcast %cst_53 : f32 to vector<8x256xf32>
    %235 = arith.mulf %234, %233 : vector<8x256xf32>
    %236 = arith.addf %231, %235 : vector<8x256xf32>
    %cst_54 = arith.constant 1.000000e+00 : f32
    %237 = vector.broadcast %cst_54 : f32 to vector<1x256xf32>
    %238 = arith.subf %237, %109 : vector<1x256xf32>
    %cst_55 = arith.constant 1.000000e+09 : f32
    %239 = vector.broadcast %cst_55 : f32 to vector<1x256xf32>
    %240 = arith.mulf %239, %238 : vector<1x256xf32>
    %241 = vector.broadcast %240 : vector<1x256xf32> to vector<8x256xf32>
    %242 = arith.addf %236, %241 : vector<8x256xf32>
    %c0_56 = arith.constant 0 : index
    %c0_57 = arith.constant 0 : index
    %c0_58 = arith.constant 0 : index
    %243 = vector.load %arg7[%c0_56, %c0_57, %c0_58] : memref<1x8x256xf32, #tpu.memory_space<vmem>>, vector<1x8x256xf32>
    %244 = vector.shape_cast %243 : vector<1x8x256xf32> to vector<8x256xf32>
    %245 = vector.shape_cast %242 : vector<8x256xf32> to vector<1x8x256xf32>
    tpu.vector_store %arg7[%c0_56, %c0_57, %c0_58], %245 {strides = array<i32>} : memref<1x8x256xf32, #tpu.memory_space<vmem>>, vector<1x8x256xf32>,
    %c0_59 = arith.constant 0 : index
    %c0_60 = arith.constant 0 : index
    %c0_61 = arith.constant 0 : index
    %246 = vector.load %arg8[%c0_59, %c0_60, %c0_61] : memref<1x8x256xf32, #tpu.memory_space<vmem>>, vector<1x8x256xf32>
    %247 = vector.shape_cast %246 : vector<1x8x256xf32> to vector<8x256xf32>
    %248 = vector.shape_cast %165 : vector<8x256xf32> to vector<1x8x256xf32>
    tpu.vector_store %arg8[%c0_59, %c0_60, %c0_61], %248 {strides = array<i32>} : memref<1x8x256xf32, #tpu.memory_space<vmem>>, vector<1x8x256xf32>,
    %c0_62 = arith.constant 0 : index
    %c0_63 = arith.constant 0 : index
    %c0_64 = arith.constant 0 : index
    %249 = vector.load %arg9[%c0_62, %c0_63, %c0_64] : memref<1x1x256xf32, #tpu.memory_space<vmem>>, vector<1x1x256xf32>
    %250 = vector.shape_cast %249 : vector<1x1x256xf32> to vector<1x256xf32>
    %251 = vector.shape_cast %109 : vector<1x256xf32> to vector<1x1x256xf32>
    tpu.vector_store %arg9[%c0_62, %c0_63, %c0_64], %251 {strides = array<i32>} : memref<1x1x256xf32, #tpu.memory_space<vmem>>, vector<1x1x256xf32>,
    return
  }
  func.func @transform_0(%arg0: i32, %arg1: i32) -> (i32, i32, i32) {
    %c0_i32 = arith.constant 0 : i32
    %c0_i32_0 = arith.constant 0 : i32
    return %arg0, %c0_i32, %arg1 : i32, i32, i32
  }
  func.func @transform_1(%arg0: i32, %arg1: i32) -> (i32, i32, i32) {
    %c0_i32 = arith.constant 0 : i32
    %c0_i32_0 = arith.constant 0 : i32
    %c0_i32_1 = arith.constant 0 : i32
    return %arg0, %c0_i32, %c0_i32_0 : i32, i32, i32
  }
  func.func @transform_2(%arg0: i32, %arg1: i32) -> (i32, i32, i32) {
    %c0_i32 = arith.constant 0 : i32
    %c0_i32_0 = arith.constant 0 : i32
    %c0_i32_1 = arith.constant 0 : i32
    return %arg0, %c0_i32, %c0_i32_0 : i32, i32, i32
  }
  func.func @transform_3(%arg0: i32, %arg1: i32) -> (i32, i32) {
    %c0_i32 = arith.constant 0 : i32
    %c0_i32_0 = arith.constant 0 : i32
    return %c0_i32, %arg1 : i32, i32
  }
  func.func @transform_4(%arg0: i32, %arg1: i32) -> (i32, i32, i32) {
    %c0_i32 = arith.constant 0 : i32
    %c0_i32_0 = arith.constant 0 : i32
    return %arg0, %c0_i32, %arg1 : i32, i32, i32
  }
  func.func @transform_5(%arg0: i32, %arg1: i32) -> (i32, i32, i32) {
    %c0_i32 = arith.constant 0 : i32
    %c0_i32_0 = arith.constant 0 : i32
    return %arg0, %c0_i32, %arg1 : i32, i32, i32
  }
  func.func @transform_6(%arg0: i32, %arg1: i32) -> (i32, i32, i32) {
    %c0_i32 = arith.constant 0 : i32
    %c0_i32_0 = arith.constant 0 : i32
    return %arg0, %c0_i32, %arg1 : i32, i32, i32
  }
  func.func @transform_7(%arg0: i32, %arg1: i32) -> (i32, i32, i32) {
    %c0_i32 = arith.constant 0 : i32
    %c0_i32_0 = arith.constant 0 : i32
    return %arg0, %c0_i32, %arg1 : i32, i32, i32
  }
}

module attributes {stable_mosaic.version = 11 : i64} {
  func.func @_loss_kernel(%arg0: i32, %arg1: i32, %arg2: memref<1x9x256xf32, #tpu.memory_space<vmem>>, %arg3: memref<1x4x256xf32, #tpu.memory_space<vmem>>, %arg4: memref<1x4x256xf32, #tpu.memory_space<vmem>>, %arg5: memref<1x4x256xf32, #tpu.memory_space<vmem>>, %arg6: memref<1x1x256xf32, #tpu.memory_space<vmem>>, %arg7: memref<1x256xf32, #tpu.memory_space<vmem>>, %arg8: memref<1x1x1xf32, #tpu.memory_space<vmem>>, %arg9: memref<1x1x1xf32, #tpu.memory_space<vmem>>, %arg10: memref<1x1x1xf32, #tpu.memory_space<vmem>>, %arg11: memref<1x256xf32, #tpu.memory_space<vmem>>, %arg12: memref<1x256xf32, #tpu.memory_space<vmem>>, %arg13: memref<4x256xf32, #tpu.memory_space<vmem>>) attributes {dimension_semantics = [#tpu.dimension_semantics<parallel>, #tpu.dimension_semantics<arbitrary>], iteration_bounds = array<i64: 2, 1>, scalar_prefetch = 0 : i64, scratch_operands = 3 : i64, tpu.core_type = #tpu.core_type<tc>, window_params = [{transform_indices = @transform_0, window_bounds = array<i64: 1, 9, 256>}, {transform_indices = @transform_1, window_bounds = array<i64: 1, 4, 256>}, {transform_indices = @transform_2, window_bounds = array<i64: 1, 4, 256>}, {transform_indices = @transform_3, window_bounds = array<i64: 1, 4, 256>}, {transform_indices = @transform_4, window_bounds = array<i64: 1, 1, 256>}, {transform_indices = @transform_5, window_bounds = array<i64: 1, 256>}, {transform_indices = @transform_6, window_bounds = array<i64: 1, 1, 1>}, {transform_indices = @transform_7, window_bounds = array<i64: 1, 1, 1>}, {transform_indices = @transform_8, window_bounds = array<i64: 1, 1, 1>}]} {
    %c0_i32 = arith.constant 0 : i32
    %0 = arith.cmpi eq, %arg1, %c0_i32 : i32
    %1 = arith.extui %0 : i1 to i32
    %c0_i32_0 = arith.constant 0 : i32
    %2 = arith.cmpi ne, %1, %c0_i32_0 : i32
    scf.if %2 {
      %cst_44 = arith.constant 0.000000e+00 : f32
      %108 = vector.broadcast %cst_44 : f32 to vector<1x256xf32>
      %c0_45 = arith.constant 0 : index
      %c0_46 = arith.constant 0 : index
      %109 = vector.load %arg11[%c0_45, %c0_46] : memref<1x256xf32, #tpu.memory_space<vmem>>, vector<1x256xf32>
      tpu.vector_store %arg11[%c0_45, %c0_46], %108 {strides = array<i32>} : memref<1x256xf32, #tpu.memory_space<vmem>>, vector<1x256xf32>,
      %cst_47 = arith.constant 0.000000e+00 : f32
      %110 = vector.broadcast %cst_47 : f32 to vector<1x256xf32>
      %c0_48 = arith.constant 0 : index
      %c0_49 = arith.constant 0 : index
      %111 = vector.load %arg12[%c0_48, %c0_49] : memref<1x256xf32, #tpu.memory_space<vmem>>, vector<1x256xf32>
      tpu.vector_store %arg12[%c0_48, %c0_49], %110 {strides = array<i32>} : memref<1x256xf32, #tpu.memory_space<vmem>>, vector<1x256xf32>,
      %cst_50 = arith.constant 0.000000e+00 : f32
      %112 = vector.broadcast %cst_50 : f32 to vector<4x256xf32>
      %c0_51 = arith.constant 0 : index
      %c0_52 = arith.constant 0 : index
      %113 = vector.load %arg13[%c0_51, %c0_52] : memref<4x256xf32, #tpu.memory_space<vmem>>, vector<4x256xf32>
      tpu.vector_store %arg13[%c0_51, %c0_52], %112 {strides = array<i32>} : memref<4x256xf32, #tpu.memory_space<vmem>>, vector<4x256xf32>,
    } else {
    }
    %c0 = arith.constant 0 : index
    %c0_1 = arith.constant 0 : index
    %c0_2 = arith.constant 0 : index
    %3 = vector.load %arg2[%c0, %c0_1, %c0_2] : memref<1x9x256xf32, #tpu.memory_space<vmem>>, vector<1x9x256xf32>
    %4 = vector.shape_cast %3 : vector<1x9x256xf32> to vector<9x256xf32>
    %c0_3 = arith.constant 0 : index
    %c0_4 = arith.constant 0 : index
    %c0_5 = arith.constant 0 : index
    %5 = vector.load %arg3[%c0_3, %c0_4, %c0_5] : memref<1x4x256xf32, #tpu.memory_space<vmem>>, vector<1x4x256xf32>
    %6 = vector.shape_cast %5 : vector<1x4x256xf32> to vector<4x256xf32>
    %c0_6 = arith.constant 0 : index
    %c0_7 = arith.constant 0 : index
    %c0_8 = arith.constant 0 : index
    %7 = vector.load %arg4[%c0_6, %c0_7, %c0_8] : memref<1x4x256xf32, #tpu.memory_space<vmem>>, vector<1x4x256xf32>
    %8 = vector.shape_cast %7 : vector<1x4x256xf32> to vector<4x256xf32>
    %c0_9 = arith.constant 0 : index
    %c0_10 = arith.constant 0 : index
    %c0_11 = arith.constant 0 : index
    %9 = vector.load %arg5[%c0_9, %c0_10, %c0_11] : memref<1x4x256xf32, #tpu.memory_space<vmem>>, vector<1x4x256xf32>
    %10 = vector.shape_cast %9 : vector<1x4x256xf32> to vector<4x256xf32>
    %c0_12 = arith.constant 0 : index
    %c0_13 = arith.constant 0 : index
    %c0_14 = arith.constant 0 : index
    %11 = vector.load %arg6[%c0_12, %c0_13, %c0_14] : memref<1x1x256xf32, #tpu.memory_space<vmem>>, vector<1x1x256xf32>
    %12 = vector.shape_cast %11 : vector<1x1x256xf32> to vector<1x256xf32>
    %c0_15 = arith.constant 0 : index
    %c0_16 = arith.constant 0 : index
    %13 = vector.load %arg7[%c0_15, %c0_16] : memref<1x256xf32, #tpu.memory_space<vmem>>, vector<1x256xf32>
    %14 = vector.extract_strided_slice %6 {offsets = [0, 0], sizes = [1, 256], strides = [1, 1]} : vector<4x256xf32> to vector<1x256xf32>
    %15 = vector.extract_strided_slice %6 {offsets = [1, 0], sizes = [1, 256], strides = [1, 1]} : vector<4x256xf32> to vector<1x256xf32>
    %16 = vector.extract_strided_slice %6 {offsets = [2, 0], sizes = [1, 256], strides = [1, 1]} : vector<4x256xf32> to vector<1x256xf32>
    %17 = vector.extract_strided_slice %6 {offsets = [3, 0], sizes = [1, 256], strides = [1, 1]} : vector<4x256xf32> to vector<1x256xf32>
    %18 = vector.extract_strided_slice %8 {offsets = [0, 0], sizes = [1, 256], strides = [1, 1]} : vector<4x256xf32> to vector<1x256xf32>
    %19 = vector.extract_strided_slice %8 {offsets = [1, 0], sizes = [1, 256], strides = [1, 1]} : vector<4x256xf32> to vector<1x256xf32>
    %20 = vector.extract_strided_slice %8 {offsets = [2, 0], sizes = [1, 256], strides = [1, 1]} : vector<4x256xf32> to vector<1x256xf32>
    %21 = vector.extract_strided_slice %8 {offsets = [3, 0], sizes = [1, 256], strides = [1, 1]} : vector<4x256xf32> to vector<1x256xf32>
    %cst = arith.constant 5.000000e-01 : f32
    %22 = vector.broadcast %cst : f32 to vector<1x256xf32>
    %23 = arith.mulf %22, %16 : vector<1x256xf32>
    %24 = arith.subf %14, %23 : vector<1x256xf32>
    %cst_17 = arith.constant 5.000000e-01 : f32
    %25 = vector.broadcast %cst_17 : f32 to vector<1x256xf32>
    %26 = arith.mulf %25, %20 : vector<1x256xf32>
    %27 = arith.subf %18, %26 : vector<1x256xf32>
    %28 = arith.maximumf %24, %27 : vector<1x256xf32>
    %cst_18 = arith.constant 5.000000e-01 : f32
    %29 = vector.broadcast %cst_18 : f32 to vector<1x256xf32>
    %30 = arith.mulf %29, %17 : vector<1x256xf32>
    %31 = arith.subf %15, %30 : vector<1x256xf32>
    %cst_19 = arith.constant 5.000000e-01 : f32
    %32 = vector.broadcast %cst_19 : f32 to vector<1x256xf32>
    %33 = arith.mulf %32, %21 : vector<1x256xf32>
    %34 = arith.subf %19, %33 : vector<1x256xf32>
    %35 = arith.maximumf %31, %34 : vector<1x256xf32>
    %cst_20 = arith.constant 5.000000e-01 : f32
    %36 = vector.broadcast %cst_20 : f32 to vector<1x256xf32>
    %37 = arith.mulf %36, %16 : vector<1x256xf32>
    %38 = arith.addf %14, %37 : vector<1x256xf32>
    %cst_21 = arith.constant 5.000000e-01 : f32
    %39 = vector.broadcast %cst_21 : f32 to vector<1x256xf32>
    %40 = arith.mulf %39, %20 : vector<1x256xf32>
    %41 = arith.addf %18, %40 : vector<1x256xf32>
    %42 = arith.minimumf %38, %41 : vector<1x256xf32>
    %cst_22 = arith.constant 5.000000e-01 : f32
    %43 = vector.broadcast %cst_22 : f32 to vector<1x256xf32>
    %44 = arith.mulf %43, %17 : vector<1x256xf32>
    %45 = arith.addf %15, %44 : vector<1x256xf32>
    %cst_23 = arith.constant 5.000000e-01 : f32
    %46 = vector.broadcast %cst_23 : f32 to vector<1x256xf32>
    %47 = arith.mulf %46, %21 : vector<1x256xf32>
    %48 = arith.addf %19, %47 : vector<1x256xf32>
    %49 = arith.minimumf %45, %48 : vector<1x256xf32>
    %50 = arith.cmpf olt, %28, %42 : vector<1x256xf32>
    %51 = arith.cmpf olt, %35, %49 : vector<1x256xf32>
    %52 = arith.andi %50, %51 : vector<1x256xi1>
    %53 = arith.extui %52 : vector<1x256xi1> to vector<1x256xi32>
    %54 = arith.sitofp %53 : vector<1x256xi32> to vector<1x256xf32>
    %55 = arith.subf %42, %28 : vector<1x256xf32>
    %56 = arith.subf %49, %35 : vector<1x256xf32>
    %57 = arith.mulf %55, %56 : vector<1x256xf32>
    %58 = arith.mulf %57, %54 : vector<1x256xf32>
    %59 = arith.mulf %16, %17 : vector<1x256xf32>
    %60 = arith.mulf %20, %21 : vector<1x256xf32>
    %61 = arith.addf %59, %60 : vector<1x256xf32>
    %62 = arith.subf %61, %58 : vector<1x256xf32>
    %cst_24 = arith.constant 1.000000e-16 : f32
    %63 = vector.broadcast %cst_24 : f32 to vector<1x256xf32>
    %64 = arith.addf %62, %63 : vector<1x256xf32>
    %65 = tpu.reciprocal %64 {approx = true} : vector<1x256xf32> -> vector<1x256xf32>
    %66 = arith.mulf %58, %65 : vector<1x256xf32>
    %c0_25 = arith.constant 0 : index
    %c0_26 = arith.constant 0 : index
    %67 = vector.load %arg11[%c0_25, %c0_26] : memref<1x256xf32, #tpu.memory_space<vmem>>, vector<1x256xf32>
    %68 = arith.mulf %66, %66 : vector<1x256xf32>
    %cst_27 = arith.constant 1.000000e+00 : f32
    %69 = vector.broadcast %cst_27 : f32 to vector<1x256xf32>
    %70 = arith.subf %69, %68 : vector<1x256xf32>
    %71 = arith.mulf %70, %12 : vector<1x256xf32>
    %72 = arith.addf %67, %71 : vector<1x256xf32>
    %c0_28 = arith.constant 0 : index
    %c0_29 = arith.constant 0 : index
    %73 = vector.load %arg11[%c0_28, %c0_29] : memref<1x256xf32, #tpu.memory_space<vmem>>, vector<1x256xf32>
    tpu.vector_store %arg11[%c0_28, %c0_29], %72 {strides = array<i32>} : memref<1x256xf32, #tpu.memory_space<vmem>>, vector<1x256xf32>,
    %c0_30 = arith.constant 0 : index
    %c0_31 = arith.constant 0 : index
    %74 = vector.load %arg12[%c0_30, %c0_31] : memref<1x256xf32, #tpu.memory_space<vmem>>, vector<1x256xf32>
    %75 = vector.extract_strided_slice %4 {offsets = [4, 0], sizes = [1, 256], strides = [1, 1]} : vector<9x256xf32> to vector<1x256xf32>
    %cst_32 = arith.constant 0.000000e+00 : f32
    %76 = vector.broadcast %cst_32 : f32 to vector<1x256xf32>
    %77 = arith.maximumf %75, %76 : vector<1x256xf32>
    %78 = arith.mulf %75, %12 : vector<1x256xf32>
    %79 = arith.subf %77, %78 : vector<1x256xf32>
    %80 = math.absf %75 : vector<1x256xf32>
    %cst_33 = arith.constant 0.000000e+00 : f32
    %81 = vector.broadcast %cst_33 : f32 to vector<1x256xf32>
    %82 = arith.subf %81, %80 : vector<1x256xf32>
    %83 = math.exp %82 : vector<1x256xf32>
    %84 = math.log1p %83 : vector<1x256xf32>
    %85 = arith.addf %79, %84 : vector<1x256xf32>
    %86 = arith.mulf %85, %13 : vector<1x256xf32>
    %87 = arith.addf %74, %86 : vector<1x256xf32>
    %c0_34 = arith.constant 0 : index
    %c0_35 = arith.constant 0 : index
    %88 = vector.load %arg12[%c0_34, %c0_35] : memref<1x256xf32, #tpu.memory_space<vmem>>, vector<1x256xf32>
    tpu.vector_store %arg12[%c0_34, %c0_35], %87 {strides = array<i32>} : memref<1x256xf32, #tpu.memory_space<vmem>>, vector<1x256xf32>,
    %c0_36 = arith.constant 0 : index
    %c0_37 = arith.constant 0 : index
    %89 = vector.load %arg13[%c0_36, %c0_37] : memref<4x256xf32, #tpu.memory_space<vmem>>, vector<4x256xf32>
    %90 = vector.extract_strided_slice %4 {offsets = [5, 0], sizes = [4, 256], strides = [1, 1]} : vector<9x256xf32> to vector<4x256xf32>
    %cst_38 = arith.constant 0.000000e+00 : f32
    %91 = vector.broadcast %cst_38 : f32 to vector<4x256xf32>
    %92 = arith.maximumf %90, %91 : vector<4x256xf32>
    %93 = arith.mulf %90, %10 : vector<4x256xf32>
    %94 = arith.subf %92, %93 : vector<4x256xf32>
    %95 = math.absf %90 : vector<4x256xf32>
    %cst_39 = arith.constant 0.000000e+00 : f32
    %96 = vector.broadcast %cst_39 : f32 to vector<4x256xf32>
    %97 = arith.subf %96, %95 : vector<4x256xf32>
    %98 = math.exp %97 : vector<4x256xf32>
    %99 = math.log1p %98 : vector<4x256xf32>
    %100 = arith.addf %94, %99 : vector<4x256xf32>
    %101 = vector.broadcast %12 : vector<1x256xf32> to vector<4x256xf32>
    %102 = arith.mulf %100, %101 : vector<4x256xf32>
    %103 = arith.addf %89, %102 : vector<4x256xf32>
    %c0_40 = arith.constant 0 : index
    %c0_41 = arith.constant 0 : index
    %104 = vector.load %arg13[%c0_40, %c0_41] : memref<4x256xf32, #tpu.memory_space<vmem>>, vector<4x256xf32>
    tpu.vector_store %arg13[%c0_40, %c0_41], %103 {strides = array<i32>} : memref<4x256xf32, #tpu.memory_space<vmem>>, vector<4x256xf32>,
    %c0_i32_42 = arith.constant 0 : i32
    %105 = arith.cmpi eq, %arg1, %c0_i32_42 : i32
    %106 = arith.extui %105 : i1 to i32
    %c0_i32_43 = arith.constant 0 : i32
    %107 = arith.cmpi ne, %106, %c0_i32_43 : i32
    scf.if %107 {
      %c0_44 = arith.constant 0 : index
      %c0_45 = arith.constant 0 : index
      %108 = vector.load %arg11[%c0_44, %c0_45] : memref<1x256xf32, #tpu.memory_space<vmem>>, vector<1x256xf32>
      %109 = vector.shape_cast %108 : vector<1x256xf32> to vector<1x1x256xf32>
      %cst_46 = arith.constant dense<0.000000e+00> : vector<1xf32>
      %110 = vector.multi_reduction <add>, %109, %cst_46 [1, 2] : vector<1x1x256xf32> to vector<1xf32>
      %111 = vector.shape_cast %110 : vector<1xf32> to vector<1x1x1xf32>
      %112 = vector.extract %111[0, 0, 0] : f32 from vector<1x1x1xf32>
      %113 = vector.broadcast %112 : f32 to vector<1x1xf32>
      %c0_47 = arith.constant 0 : index
      %c0_48 = arith.constant 0 : index
      %c0_49 = arith.constant 0 : index
      %114 = vector.load %arg8[%c0_47, %c0_48, %c0_49] : memref<1x1x1xf32, #tpu.memory_space<vmem>>, vector<1x1x1xf32>
      %115 = vector.shape_cast %114 : vector<1x1x1xf32> to vector<1x1xf32>
      %116 = vector.shape_cast %113 : vector<1x1xf32> to vector<1x1x1xf32>
      tpu.vector_store %arg8[%c0_47, %c0_48, %c0_49], %116 {strides = array<i32>} : memref<1x1x1xf32, #tpu.memory_space<vmem>>, vector<1x1x1xf32>,
      %c0_50 = arith.constant 0 : index
      %c0_51 = arith.constant 0 : index
      %117 = vector.load %arg12[%c0_50, %c0_51] : memref<1x256xf32, #tpu.memory_space<vmem>>, vector<1x256xf32>
      %118 = vector.shape_cast %117 : vector<1x256xf32> to vector<1x1x256xf32>
      %cst_52 = arith.constant dense<0.000000e+00> : vector<1xf32>
      %119 = vector.multi_reduction <add>, %118, %cst_52 [1, 2] : vector<1x1x256xf32> to vector<1xf32>
      %120 = vector.shape_cast %119 : vector<1xf32> to vector<1x1x1xf32>
      %121 = vector.extract %120[0, 0, 0] : f32 from vector<1x1x1xf32>
      %122 = vector.broadcast %121 : f32 to vector<1x1xf32>
      %c0_53 = arith.constant 0 : index
      %c0_54 = arith.constant 0 : index
      %c0_55 = arith.constant 0 : index
      %123 = vector.load %arg9[%c0_53, %c0_54, %c0_55] : memref<1x1x1xf32, #tpu.memory_space<vmem>>, vector<1x1x1xf32>
      %124 = vector.shape_cast %123 : vector<1x1x1xf32> to vector<1x1xf32>
      %125 = vector.shape_cast %122 : vector<1x1xf32> to vector<1x1x1xf32>
      tpu.vector_store %arg9[%c0_53, %c0_54, %c0_55], %125 {strides = array<i32>} : memref<1x1x1xf32, #tpu.memory_space<vmem>>, vector<1x1x1xf32>,
      %c0_56 = arith.constant 0 : index
      %c0_57 = arith.constant 0 : index
      %126 = vector.load %arg13[%c0_56, %c0_57] : memref<4x256xf32, #tpu.memory_space<vmem>>, vector<4x256xf32>
      %127 = vector.shape_cast %126 : vector<4x256xf32> to vector<1x4x256xf32>
      %cst_58 = arith.constant dense<0.000000e+00> : vector<1xf32>
      %128 = vector.multi_reduction <add>, %127, %cst_58 [1, 2] : vector<1x4x256xf32> to vector<1xf32>
      %129 = vector.shape_cast %128 : vector<1xf32> to vector<1x1x1xf32>
      %130 = vector.extract %129[0, 0, 0] : f32 from vector<1x1x1xf32>
      %131 = vector.broadcast %130 : f32 to vector<1x1xf32>
      %c0_59 = arith.constant 0 : index
      %c0_60 = arith.constant 0 : index
      %c0_61 = arith.constant 0 : index
      %132 = vector.load %arg10[%c0_59, %c0_60, %c0_61] : memref<1x1x1xf32, #tpu.memory_space<vmem>>, vector<1x1x1xf32>
      %133 = vector.shape_cast %132 : vector<1x1x1xf32> to vector<1x1xf32>
      %134 = vector.shape_cast %131 : vector<1x1xf32> to vector<1x1x1xf32>
      tpu.vector_store %arg10[%c0_59, %c0_60, %c0_61], %134 {strides = array<i32>} : memref<1x1x1xf32, #tpu.memory_space<vmem>>, vector<1x1x1xf32>,
    } else {
    }
    return
  }
  func.func @transform_0(%arg0: i32, %arg1: i32) -> (i32, i32, i32) {
    %c0_i32 = arith.constant 0 : i32
    %c0_i32_0 = arith.constant 0 : i32
    return %arg0, %c0_i32, %arg1 : i32, i32, i32
  }
  func.func @transform_1(%arg0: i32, %arg1: i32) -> (i32, i32, i32) {
    %c0_i32 = arith.constant 0 : i32
    %c0_i32_0 = arith.constant 0 : i32
    return %arg0, %c0_i32, %arg1 : i32, i32, i32
  }
  func.func @transform_2(%arg0: i32, %arg1: i32) -> (i32, i32, i32) {
    %c0_i32 = arith.constant 0 : i32
    %c0_i32_0 = arith.constant 0 : i32
    return %arg0, %c0_i32, %arg1 : i32, i32, i32
  }
  func.func @transform_3(%arg0: i32, %arg1: i32) -> (i32, i32, i32) {
    %c0_i32 = arith.constant 0 : i32
    %c0_i32_0 = arith.constant 0 : i32
    return %arg0, %c0_i32, %arg1 : i32, i32, i32
  }
  func.func @transform_4(%arg0: i32, %arg1: i32) -> (i32, i32, i32) {
    %c0_i32 = arith.constant 0 : i32
    %c0_i32_0 = arith.constant 0 : i32
    return %arg0, %c0_i32, %arg1 : i32, i32, i32
  }
  func.func @transform_5(%arg0: i32, %arg1: i32) -> (i32, i32) {
    %c0_i32 = arith.constant 0 : i32
    %c0_i32_0 = arith.constant 0 : i32
    return %c0_i32, %arg1 : i32, i32
  }
  func.func @transform_6(%arg0: i32, %arg1: i32) -> (i32, i32, i32) {
    %c0_i32 = arith.constant 0 : i32
    %c0_i32_0 = arith.constant 0 : i32
    %c0_i32_1 = arith.constant 0 : i32
    return %arg0, %c0_i32, %c0_i32_0 : i32, i32, i32
  }
  func.func @transform_7(%arg0: i32, %arg1: i32) -> (i32, i32, i32) {
    %c0_i32 = arith.constant 0 : i32
    %c0_i32_0 = arith.constant 0 : i32
    %c0_i32_1 = arith.constant 0 : i32
    return %arg0, %c0_i32, %c0_i32_0 : i32, i32, i32
  }
  func.func @transform_8(%arg0: i32, %arg1: i32) -> (i32, i32, i32) {
    %c0_i32 = arith.constant 0 : i32
    %c0_i32_0 = arith.constant 0 : i32
    %c0_i32_1 = arith.constant 0 : i32
    return %arg0, %c0_i32, %c0_i32_0 : i32, i32, i32
  }
}

</mosaic_0001>

<bundles_post_ra>
// kernel: neg.2
= control target key start
LH: loop header
LB: loop body
LE: loop exit
PB: predicated region body
PF: predicated region fallthrough
CT: control target
= control target key end

     0   :  { %s72_s0 = inlined_call_operand.vmem [shape: f32[2,8,256], index: 0, kind: input, shape index: {}]   ;;  %s73_s1 = inlined_call_operand.vmem [shape: f32[2,8,256], index: 1, kind: output, shape index: {}]  }
   0x1   :  { %v2_v0 = vld [vmem:[%s72_s0] sm:$0xff]  ;;  %v32_v1 = vld [vmem:[%s72_s0 + $0x10] sm:$0xff]  ;;  %v34_v2 = vld [vmem:[%s72_s0 + $0x8] sm:$0xff] }
   0x2   :  { %v5_v3 = vxor.u32 2147483648, %v2_v0  ;;  %v12_v4 = vxor.u32 2147483648, %v32_v1  ;;  %v20_v5 = vxor.u32 2147483648, %v34_v2  ;;  %v36_v6 = vld [vmem:[%s72_s0 + $0x18] sm:$0xff] }
   0x3   :  { %v28_v7 = vxor.u32 2147483648, %v36_v6 }
   0x4   :  { %7 = vst [vmem:[%s73_s1] sm:$0xff] %v5_v3  ;;  %33 = vst [vmem:[%s73_s1 + $0x10] sm:$0xff] %v12_v4 }
   0x5   :  { %35 = vst [vmem:[%s73_s1 + $0x8] sm:$0xff] %v20_v5  ;;  %37 = vst [vmem:[%s73_s1 + $0x18] sm:$0xff] %v28_v7 }

// kernel: loss_fn.2
= control target key start
LH: loop header
LB: loop body
LE: loop exit
PB: predicated region body
PF: predicated region fallthrough
CT: control target
= control target key end

     0   :  { %s1547_s24 = smov 0   ;;  %s1549_s25 = smov 0   ;;  %s1834_s0 = inlined_call_operand.vmem [shape: f32[2,9,256], index: 0, kind: input, shape index: {}]   ;;  %s1835_s1 = inlined_call_operand.vmem [shape: f32[2,8,4], index: 1, kind: input, shape index: {}]   ;;  %s1836_s2 = inlined_call_operand.vmem [shape: f32[2,8,4], index: 2, kind: input, shape index: {}]   ;;  %s1837_s3 = inlined_call_operand.vmem [shape: f32[3,256], index: 3, kind: input, shape index: {}]   ;;  %s1838_s4 = inlined_call_operand.vmem [shape: f32[2,4,256], index: 4, kind: output, shape index: {0}]   ;;  %s1839_s5 = inlined_call_operand.vmem [shape: f32[2,8,256], index: 5, kind: output, shape index: {1}]   ;;  %s1840_s6 = inlined_call_operand.vmem [shape: f32[2,8,256], index: 6, kind: output, shape index: {2}]   ;;  %s1841_s7 = inlined_call_operand.vmem [shape: f32[2,1,256], index: 7, kind: output, shape index: {3}]  }
   0x1   :  { %s1551_s26 = smov 0  }
   0x2 LB: > { %s30_s27 = sadd.s32 1, %s1494_s25  ;;  %p1363_p0 = scmp.ge.s32.totalorder %s1498_s26, 1  ;;  %s1498_s26 = sphi %s1551_s26, %s18_s26   ;;  %s1494_s25 = sphi %s1549_s25, %s1851_s25   ;;  %s1490_s24 = sphi %s1547_s24, %s1850_s24  }
   0x3   : > { %p32_p1 = scmp.ge.s32.totalorder %s30_s27, 2  ;;  %p300_p2 = scmp.lt.s32.totalorder %s1498_s26, 3 }
   0x5   : > { %s1853_s27 = smov (%p32_p1, %s30_s27), 0  ;;  %p301_p3 = pnand %p1363_p0, %p300_p2 }
   0x6   : > { %p380_p4 = scmp.lt.s32.totalorder (!%p301_p3), %s1490_s24, 1  ;;  %s1502_s13 = smov (!%p301_p3), 126  }
   0x7   : > { %304 = sbr.rel (%p301_p3) target bundleno = 331 (0x14b), region = 36  ;;  %s1503_s16 = smov (!%p301_p3), 127  }
   0xc   : > { %v1500_v0 = vmov 0   ;;  %s1855_s24 = smov (!%p380_p4, %s1490_s24), 1  ;;  %v1501_v1 = vmov 1   ;;  %v455_v2 = vlaneseq  ;;  %v1599_v17 = vld [vmem:[%s1837_s3] sm:$0x77]  ;;  %vm481_vm0 = vcmask 1041408  }
   0xd   : > { %1026 = vmatprep.mubr.bf16.mxu0 %v1500_v0  ;;  %1424 = vset.pattern.permute.xlu1 %v1500_v0  ;;  %s1571_s28 = sshll.u32 %s1855_s24, 3  ;;  %s1389_s29 = sshll.u32 %s1855_s24, 5  ;;  %v451_v27 = vcombine.high %v1599_v17, %v1599_v17  ;;  %vm984_vm13 = vcmask 31744   ;;  %vm935_vm14 = vcmask 1042432  }
   0xe   : > { %1425 = vset.pattern.permute.xlu0 %v1501_v1  ;;  %s392_s9 = scalar_lea.vmem %s1835_s1, %s1571_s28  ;;  %s387_s12 = scalar_lea.vmem %s1834_s0, %s1389_s29  ;;  %v1585_v9 = vshrl.u32 %v455_v2, 7 }
   0xf   : > { %v1581_v3 = vld [vmem:[%s392_s9] sm:$0xff]  ;;  %v444_v5 = vld [vmem:[%s387_s12 + $0x8] sm:$0xff]  ;;  %v446_v7 = vld [vmem:[%s387_s12 + $0x18] sm:$0x1]  ;;  %s411_s19 = scalar_lea.vmem %s1838_s4, %s1571_s28  ;;  %s396_s22 = scalar_lea.vmem %s1836_s2, %s1571_s28 }
  0x10   : > { %v443_v4 = vld [vmem:[%s387_s12] sm:$0xff]  ;;  %v498_v6 = vmul.f32 0.5, %v1581_v3  ;;  %v477_v10 = vmul.f32 1.442695, %v444_v5  ;;  %v445_v12 = vld [vmem:[%s387_s12 + $0x10] sm:$0x1]  ;;  %v454_v36 = vadd.f32 %v451_v27, %v444_v5 }
  0x11   : > { %v475_v8 = vmul.f32 1.442695, %v443_v4  ;;  %v1587_v11 = vsub.f32 0.0, %v443_v4  ;;  %v1589_v13 = vsub.f32 0.0, %v444_v5  ;;  %v1591_v14 = vsub.f32 0.0, %v446_v7  ;;  %s1391_s23 = sshll.u32 %s1855_s24, 4 }
  0x12   : > { %500 = vrot.lane.b32.xlu0 %v498_v6, %s1502_s13  ;;  %v1593_v15 = vsub.f32 0.0, %v445_v12  ;;  %v1602_v18 = vsub.s32 2, %v1585_v9  ;;  %v461_v19 = vsub.s32 6, %v1585_v9  ;;  %v453_v34 = vadd.f32 %v1599_v17, %v443_v4  ;;  %s431_s30 = scalar_lea.vmem %s1840_s6, %s1391_s23  ;;  %s1374_s8 = sshll.u32 %s1855_s24, 1 }
  0x13   : > { %1432 = vpow2.f32 %v475_v8  ;;  %v795_v16 = vand.u32 2147483647, %v1587_v11  ;;  %v796_v20 = vand.u32 2147483647, %v1589_v13  ;;  %v798_v21 = vand.u32 2147483647, %v1591_v14  ;;  %s440_s11 = scalar_lea.vmem %s1841_s7, %s1374_s8  ;;  %s421_s14 = scalar_lea.vmem %s1839_s5, %s1391_s23 }
  0x14   : > { %1434 = vpow2.f32 %v477_v10  ;;  %v797_v23 = vand.u32 2147483647, %v1593_v15  ;;  %v458_v28 = vrot.slane %v1599_v17, %v1602_v18  ;;  %v462_v30 = vrot.slane %v1599_v17, %v461_v19 }
  0x15   : > { %v799_v22 = vsub.f32 0.0, %v795_v16  ;;  %v800_v24 = vsub.f32 0.0, %v796_v20  ;;  %v802_v25 = vsub.f32 0.0, %v798_v21  ;;  %v783_v7 = vmax.f32 %v1587_v11, 0.0 }
  0x16   : > { %744 = vrot.lane.b32.xlu0 %v1581_v3, %s1503_s16  ;;  %v801_v29 = vsub.f32 0.0, %v797_v23  ;;  %v468_v35 = vrot.slane %v458_v28, %v1602_v18  ;;  %v472_v37 = vrot.slane %v462_v30, %v1602_v18  ;;  %v784_v10 = vmax.f32 %v1589_v13, 0.0 }
  0x17   : > { %v803_v26 = vmul.f32 1.442695, %v799_v22  ;;  %v805_v31 = vmul.f32 1.442695, %v800_v24  ;;  %v809_v32 = vmul.f32 1.442695, %v802_v25  ;;  %vm787_vm4 = vcmp.ne.f32.partialorder %v1587_v11, %v1587_v11 }
  0x18   : > { %v807_v33 = vmul.f32 1.442695, %v801_v29  ;;  %v1619_v40 = vmul.f32 %v468_v35, %v453_v34  ;;  %v1623_v42 = vmul.f32 %v472_v37, %v454_v36  ;;  %v786_v22 = vmax.f32 %v1591_v14, 0.0 }
  0x19   : > { %1436 = vpow2.f32 %v803_v26  ;;  %v1657_v30 = vsub.s32 4, %v1585_v9  ;;  %vm788_vm5 = vcmp.ne.f32.partialorder %v1589_v13, %v1589_v13  ;;  %vm790_vm6 = vcmp.ne.f32.partialorder %v1591_v14, %v1591_v14 }
  0x1a   : > { %1438 = vpow2.f32 %v805_v31  ;;  %v785_v34 = vmax.f32 %v1593_v15, 0.0  ;;  %vm789_vm8 = vcmp.ne.f32.partialorder %v1593_v15, %v1593_v15 }
  0x1b   : > { %1440 = vpow2.f32 %v809_v32 }
  0x1c   : > { %1442 = vpow2.f32 %v807_v33 }
  0x20   : > { %v1433_v38 = vpop.eup %1432 }
  0x21   : > { %v1435_v39 = vpop.eup %1434  ;;  %v1621_v41 = vmul.f32 %v1433_v38, %v468_v35 }
  0x22   : > { %v1625_v43 = vmul.f32 %v1435_v39, %v472_v37 }
  0x23   : > { %v482_v44 = vsel %vm481_vm0, %v1619_v40, %v1621_v41 }
  0x24   : > { %v483_v45 = vsel %vm481_vm0, %v1623_v42, %v1625_v43 }
  0x25   : > { %v486_v46 = vcombine.low %v482_v44, %v483_v45 }
  0x26   : > { %v1437_v47 = vpop.eup %1436 }
  0x27   : > { %488 = vst [vmem:[%s411_s19] sm:$0xff] %v486_v46  ;;  %v811_v48 = vadd.f32 1.0, %v1437_v47  ;;  %v1439_v49 = vpop.eup %1438  ;;  %v814_v54 = vmul.f32 -0.5, %v1437_v47  ;;  %v817_v59 = vand.u32 2147483647, %v1437_v47 }
  0x28   : > { %v1441_v50 = vpop.eup %1440  ;;  %v820_v51 = vadd.f32 1.0, %v1439_v49  ;;  %v823_v56 = vmul.f32 -0.5, %v1439_v49  ;;  %v826_v62 = vand.u32 2147483647, %v1439_v49 }
  0x29   : > { %1444 = vlog2.f32 %v811_v48  ;;  %v1443_v52 = vpop.eup %1442  ;;  %v838_v53 = vadd.f32 1.0, %v1441_v50  ;;  %v841_v57 = vmul.f32 -0.5, %v1441_v50  ;;  %v815_v58 = vadd.f32 1.0, %v814_v54 }
  0x2a   : > { %1446 = vlog2.f32 %v820_v51  ;;  %v829_v55 = vadd.f32 1.0, %v1443_v52  ;;  %v824_v60 = vadd.f32 1.0, %v823_v56  ;;  %v832_v61 = vmul.f32 -0.5, %v1443_v52 }
  0x2b   : > { %1448 = vlog2.f32 %v838_v53  ;;  %v842_v63 = vadd.f32 1.0, %v841_v57  ;;  %v844_v4 = vand.u32 2147483647, %v1441_v50  ;;  %v816_v5 = vmul.f32 %v1437_v47, %v815_v58 }
  0x2c   : > { %1450 = vlog2.f32 %v829_v55  ;;  %vm1638_vm1 = vcmp.lt.f32.partialorder %v817_v59, 0.0004427343  ;;  %v825_v12 = vmul.f32 %v1439_v49, %v824_v60  ;;  %v833_v20 = vadd.f32 1.0, %v832_v61 }
  0x2d   : > { %vm1644_vm2 = vcmp.lt.f32.partialorder %v826_v62, 0.0004427343  ;;  %v843_v24 = vmul.f32 %v1441_v50, %v842_v63  ;;  %v835_v25 = vand.u32 2147483647, %v1443_v52  ;;  %vm1648_vm3 = vcmp.lt.f32.partialorder %v844_v4, 0.0004427343 }
  0x2e   : > { %v834_v35 = vmul.f32 %v1443_v52, %v833_v20 }
  0x2f   : > { %vm836_vm7 = vcmp.lt.f32.partialorder %v835_v25, 0.0004427343 }
  0x36   : > { %v1445_v6 = vpop.eup %1444 }
  0x37   : > { %v813_v16 = vmul.f32 0.6931472, %v1445_v6  ;;  %v1447_v21 = vpop.eup %1446 }
  0x38   : > { %v1449_v26 = vpop.eup %1448  ;;  %v822_v27 = vmul.f32 0.6931472, %v1447_v21 }
  0x39   : > { %v819_v29 = vsel %vm1638_vm1, %v816_v5, %v813_v16  ;;  %v840_v31 = vmul.f32 0.6931472, %v1449_v26  ;;  %v1451_v36 = vpop.eup %1450 }
  0x3a   : > { %v847_v32 = vadd.f32 %v819_v29, %v783_v7  ;;  %v828_v33 = vsel %vm1644_vm2, %v825_v12, %v822_v27  ;;  %v831_v45 = vmul.f32 0.6931472, %v1451_v36 }
  0x3b   : > { %v846_v37 = vsel %vm1648_vm3, %v843_v24, %v840_v31  ;;  %v848_v38 = vadd.f32 %v828_v33, %v784_v10 }
  0x3c   : > { %v851_v39 = vsel %vm787_vm4, %v1587_v11, %v847_v32  ;;  %v850_v44 = vadd.f32 %v846_v37, %v786_v22  ;;  %v837_v50 = vsel %vm836_vm7, %v834_v35, %v831_v45 }
  0x3d   : > { %v855_v46 = vsub.f32 0.0, %v851_v39  ;;  %v852_v47 = vsel %vm788_vm5, %v1589_v13, %v848_v38  ;;  %v849_v53 = vadd.f32 %v837_v50, %v785_v34 }
  0x3e   : > { %v854_v48 = vsel %vm790_vm6, %v1591_v14, %v850_v44  ;;  %v856_v49 = vsub.f32 0.0, %v852_v47  ;;  %v1375_v47 = vrot.slane %v1599_v17, 10 }
  0x3f   : > { %v862_v51 = vrot.slane %v855_v46, %v1657_v30  ;;  %v858_v52 = vsub.f32 0.0, %v854_v48  ;;  %v853_v11 = vsel %vm789_vm8, %v1593_v15, %v849_v53 }
  0x40   : > { %v866_v54 = vrot.slane %v856_v49, %v1657_v30  ;;  %v857_v58 = vsub.f32 0.0, %v853_v11 }
  0x41   : > { %v867_v55 = vadd.f32 %v862_v51, %v855_v46 }
  0x42   : > { %v868_v56 = vadd.f32 %v866_v54, %v856_v49  ;;  %v870_v57 = vadd.f32 %v866_v54, %v858_v52  ;;  %v869_v14 = vadd.f32 %v862_v51, %v857_v58 }
  0x43   : > { %v1676_v13 = vmul.f32 0.5, %v867_v55 }
  0x44   : > { %v1678_v59 = vmul.f32 0.5, %v868_v56  ;;  %v1680_v60 = vmul.f32 0.5, %v870_v57  ;;  %v1685_v4 = vmul.f32 0.5, %v869_v14 }
  0x45   : > { %v875_v61 = vmax.f32 %v1676_v13, -100.0  ;;  %v448_v13 = vld [vmem:[%s396_s22] sm:$0xff] }
  0x46   : > { %v876_v62 = vmax.f32 %v1678_v59, -100.0  ;;  %v878_v63 = vmax.f32 %v1680_v60, -100.0  ;;  %v877_v7 = vmax.f32 %v1685_v4, -100.0 }
  0x47   : > { %v879_v15 = vmul.f32 1.442695, %v875_v61 }
  0x48   : > { %v881_v5 = vmul.f32 1.442695, %v876_v62  ;;  %v885_v6 = vmul.f32 1.442695, %v878_v63  ;;  %v883_v8 = vmul.f32 1.442695, %v877_v7 }
  0x49   : > { %1452 = vpow2.f32 %v879_v15 }
  0x4a   : > { %1454 = vpow2.f32 %v881_v5 }
  0x4b   : > { %1456 = vpow2.f32 %v885_v6 }
  0x4c   : > { %1458 = vpow2.f32 %v883_v8 }
  0x56   : > { %v1453_v10 = vpop.eup %1452 }
  0x57   : > { %v887_v12 = vsub.f32 0.0, %v1453_v10  ;;  %v1455_v16 = vpop.eup %1454 }
  0x58   : > { %v1457_v20 = vpop.eup %1456  ;;  %v888_v21 = vsub.f32 0.0, %v1455_v16 }
  0x59   : > { %v891_v22 = vadd.f32 1.0, %v887_v12  ;;  %v1459_v23 = vpop.eup %1458  ;;  %v890_v24 = vsub.f32 0.0, %v1457_v20  ;;  %v894_v29 = vmul.f32 -0.5, %v887_v12  ;;  %v897_v35 = vand.u32 2147483647, %v887_v12 }
  0x5a   : > { %v900_v25 = vadd.f32 1.0, %v888_v21  ;;  %v889_v26 = vsub.f32 0.0, %v1459_v23  ;;  %v903_v31 = vmul.f32 -0.5, %v888_v21  ;;  %v906_v37 = vand.u32 2147483647, %v888_v21 }
  0x5b   : > { %v918_v27 = vadd.f32 1.0, %v890_v24  ;;  %1460 = vlog2.f32 %v891_v22  ;;  %v921_v32 = vmul.f32 -0.5, %v890_v24  ;;  %v895_v33 = vadd.f32 1.0, %v894_v29 }
  0x5c   : > { %1462 = vlog2.f32 %v900_v25  ;;  %v909_v28 = vadd.f32 1.0, %v889_v26  ;;  %v904_v34 = vadd.f32 1.0, %v903_v31  ;;  %v912_v36 = vmul.f32 -0.5, %v889_v26 }
  0x5d   : > { %1464 = vlog2.f32 %v918_v27  ;;  %v922_v38 = vadd.f32 1.0, %v921_v32  ;;  %v924_v39 = vand.u32 2147483647, %v890_v24  ;;  %v896_v44 = vmul.f32 %v895_v33, %v887_v12 }
  0x5e   : > { %1466 = vlog2.f32 %v909_v28  ;;  %v905_v46 = vmul.f32 %v904_v34, %v888_v21  ;;  %vm1690_vm9 = vcmp.lt.f32.partialorder %v897_v35, 0.0004427343  ;;  %v913_v48 = vadd.f32 1.0, %v912_v36 }
  0x5f   : > { %vm907_vm10 = vcmp.lt.f32.partialorder %v906_v37, 0.0004427343  ;;  %v923_v50 = vmul.f32 %v922_v38, %v890_v24  ;;  %v915_v52 = vand.u32 2147483647, %v889_v26  ;;  %vm925_vm11 = vcmp.lt.f32.partialorder %v924_v39, 0.0004427343 }
  0x60   : > { %v914_v57 = vmul.f32 %v913_v48, %v889_v26  ;;  %v967_v29 = vpack.c.bf16 %v448_v13, %v448_v13  ;;  %v1504_v35 = vmov 2   ;;  %v1376_v48 = vrot.slane %v1599_v17, 9 }
  0x61   : > { %vm916_vm12 = vcmp.lt.f32.partialorder %v915_v52, 0.0004427343  ;;  %v541_v52 = vsub.s32 1, %v1585_v9 }
  0x68   : > { %v1461_v45 = vpop.eup %1460 }
  0x69   : > { %v1463_v49 = vpop.eup %1462  ;;  %v893_v51 = vmul.f32 0.6931472, %v1461_v45 }
  0x6a   : > { %v1465_v53 = vpop.eup %1464  ;;  %v902_v54 = vmul.f32 0.6931472, %v1463_v49  ;;  %v674_v49 = vmul.f32 0.5, %v1621_v41 }
  0x6b   : > { %v920_v55 = vmul.f32 0.6931472, %v1465_v53  ;;  %v899_v11 = vsel %vm1690_vm9, %v896_v44, %v893_v51  ;;  %v1467_v58 = vpop.eup %1466  ;;  %v545_v53 = vsub.s32 5, %v1585_v9  ;;  %vm944_vm9 = vcmask 1043456  }
  0x6c   : > { %v908_v56 = vsel %vm907_vm10, %v905_v46, %v902_v54  ;;  %v927_v14 = vmax.f32 %v899_v11, -100.0  ;;  %v911_v15 = vmul.f32 0.6931472, %v1467_v58  ;;  %v489_v46 = vadd.f32 0.5, %v1599_v17 }
  0x6d   : > { %v926_v59 = vsel %vm925_vm11, %v923_v50, %v920_v55  ;;  %v928_v60 = vmax.f32 %v908_v56, -100.0  ;;  %v678_v54 = vrot.slane %v674_v49, 2 }
  0x6e   : > { %v930_v4 = vmax.f32 %v926_v59, -100.0  ;;  %v917_v8 = vsel %vm916_vm12, %v914_v57, %v911_v15  ;;  %v961_v12 = vsub.f32 %v875_v61, %v927_v14  ;;  %v936_v37 = vrot.slane %v927_v14, 5 }
  0x6f   : > { %v962_v5 = vsub.f32 %v876_v62, %v928_v60  ;;  %v929_v10 = vmax.f32 %v917_v8, -100.0  ;;  %v939_v39 = vrot.slane %v928_v60, 5  ;;  %v493_v50 = vmul.f32 %v1375_v47, %v489_v46 }
  0x70   : > { %v964_v6 = vsub.f32 %v878_v63, %v930_v4  ;;  %v940_v44 = vrot.slane %v930_v4, 5  ;;  %v497_v51 = vmul.f32 %v1376_v48, %v489_v46  ;;  %v682_v59 = vsub.f32 %v1619_v40, %v678_v54 }
  0x71   : > { %v963_v20 = vsub.f32 %v877_v7, %v929_v10  ;;  %v937_v38 = vrot.slane %v929_v10, 5  ;;  %v512_v56 = vrot.slane %v493_v50, %v1657_v30  ;;  %v750_v60 = vrot.slane %v1621_v41, 1 }
  0x72   : > { %v966_v16 = vpack.c.bf16 %v964_v6, %v962_v5  ;;  %v1714_v45 = vsel %vm935_vm14, %v939_v39, %v940_v44  ;;  %v542_v57 = vrot.slane %v497_v51, %v541_v52  ;;  %v546_v58 = vrot.slane %v497_v51, %v545_v53 }
  0x73   : > { %v965_v23 = vpack.c.bf16 %v963_v20, %v961_v12  ;;  %v751_v14 = vrot.slane %v1625_v43, 1  ;;  %v704_v4 = vadd.f32 %v678_v54, %v1619_v40  ;;  %v577_v5 = vmul.f32 2.5, %v1599_v17 }
  0x74   : > { %v977_v21 = vshrl.u32 %v966_v16, 16  ;;  %v980_v22 = vshll.u32 %v966_v16, 16  ;;  %v1736_v12 = vrot.slane %v542_v57, %v541_v52  ;;  %v1738_v16 = vrot.slane %v546_v58, %v541_v52 }
  0x75   : > { %v969_v26 = vshrl.u32 %v965_v23, 16  ;;  %v972_v27 = vshll.u32 %v965_v23, 16  ;;  %v755_v40 = vmul.f32 %v751_v14, %v1625_v43  ;;  %v587_v17 = vrot.slane %v577_v5, %v1602_v18 }
  0x76   : > { %v979_v24 = vrot.slane %v977_v21, 2  ;;  %v982_v25 = vrot.slane %v980_v22, 3  ;;  %v754_v22 = vmul.f32 %v750_v60, %v1621_v41  ;;  %v1505_v60 = vmov 0.0  }
  0x77   : > { %v971_v63 = vrot.slane %v969_v26, 2  ;;  %v974_v28 = vrot.slane %v972_v27, 3  ;;  %v697_v26 = vrot.slane %v682_v59, %v541_v52 }
  0x78   : > { %v983_v62 = vor.u32 %v982_v25, %v979_v24 }
  0x79   : > { %v975_v61 = vor.u32 %v974_v28, %v971_v63  ;;  %v719_v63 = vrot.slane %v704_v4, %v541_v52 }
  0x7a   : > { %1385 = vmatprep.subr.msk.bf16.mxu0 %vm481_vm0, %v983_v62 }
  0x7b   : > { %v989_v7 = vsel %vm481_vm0, %v975_v61, 0 }
  0x7c   : > { %1009 = vmatpush1.bf16.msra.mxu0 %v989_v7  ;;  %v764_v7 = vrot.slane %v754_v22, %v1602_v18 }
  0x7f   : > { %1386 = vmatmul.mubr.msk.bf16.vlgmr.msra.gmra.mxu0 %vm984_vm13, %v967_v29  ;;  %v768_v29 = vrot.slane %v755_v40, %v1602_v18 }
  0x84   : > { %v501_v31 = vpop.permute.xlu0 %500 }
  0x85   : > { %v503_v32 = vsub.f32 %v1581_v3, %v501_v31  ;;  %v530_v33 = vadd.f32 %v501_v31, %v1581_v3 }
  0x87   : > { %525 = vperm.xlu1 %1424, %v503_v32   ;;  %558 = vperm.xlu0 %1425, %v503_v32   ;;  %v1752_v32 = vrot.slane %v587_v17, %v1602_v18 }
  0x88   : > { %v745_v34 = vpop.permute.xlu0 %744 }
  0x89   : > { %v747_v36 = vmul.f32 %v745_v34, %v1581_v3 }
  0x8b   : > { %533 = vperm.xlu1 %1424, %v530_v33   ;;  %1428 = vset.pattern.permute.xlu0 %v1500_v0  ;;  %v1712_v0 = vsel %vm935_vm14, %v936_v37, %v937_v38 }
  0x8c   : > { %580 = vperm.xlu0 %1428, %v1581_v3  }
  0x8f   : > { %1426 = vset.pattern.permute.xlu1 %v1501_v1 }
  0x90   : > { %564 = vperm.xlu1 %1426, %v530_v33   ;;  %1430 = vset.pattern.permute.xlu0 %v1504_v35 }
  0x94   : > { %1427 = vset.pattern.permute.xlu1 %v1504_v35 }
  0x95   : > { %758 = vperm.xlu1 %1427, %v747_v36  }
  0x99   : > { %1429 = vset.pattern.permute.xlu1 %v1501_v1  ;;  %v507_v1 = vsub.s32 0, %v1585_v9 }
  0x9a   : > { %611 = vperm.xlu1 %1429, %v1581_v3   ;;  %v675_v3 = vmul.f32 0.5, %v1625_v43 }
  0x9b   : > { %v508_v11 = vrot.slane %v493_v50, %v507_v1  ;;  %v1734_v30 = vrot.slane %v512_v56, %v507_v1  ;;  %v687_v20 = vrot.slane %v682_v59, %v507_v1  ;;  %v709_v23 = vrot.slane %v704_v4, %v507_v1 }
  0x9c   : > { %v679_v55 = vrot.slane %v675_v3, 2 }
  0x9d   : > { %v1732_v10 = vrot.slane %v508_v11, %v507_v1 }
  0x9e   : > { %v705_v15 = vadd.f32 %v679_v55, %v1623_v42  ;;  %v683_v8 = vsub.f32 %v1623_v42, %v679_v55  ;;  %v591_v42 = vrot.slane %v577_v5, %v461_v19 }
  0xa0   : > { %v713_v24 = vrot.slane %v705_v15, %v507_v1  ;;  %v691_v25 = vrot.slane %v683_v8, %v507_v1  ;;  %v701_v27 = vrot.slane %v683_v8, %v541_v52  ;;  %v723_v61 = vrot.slane %v705_v15, %v541_v52 }
  0xa1   : > { %v1755_v33 = vrot.slane %v591_v42, %v1602_v18 }
 0x102   : > { %v526_v6 = vpop.permute.xlu1 %525  ;;  %v559_v21 = vpop.permute.xlu0 %558 }
 0x103   : > { %v528_v28 = vsub.f32 %v1732_v10, %v526_v6  ;;  %v529_v13 = vsub.f32 %v1734_v30, %v526_v6  ;;  %v561_v41 = vsub.f32 %v1736_v12, %v559_v21  ;;  %v562_v43 = vsub.f32 %v1738_v16, %v559_v21 }
 0x104   : > { %v692_v34 = vmax.f32 %v526_v6, %v687_v20  ;;  %v693_v35 = vmax.f32 %v526_v6, %v691_v25  ;;  %v702_v36 = vmax.f32 %v559_v21, %v697_v26  ;;  %v703_v37 = vmax.f32 %v559_v21, %v701_v27 }
 0x105   : > { %v569_v39 = vmin.f32 %v528_v28, %v561_v41  ;;  %v570_v44 = vmin.f32 %v529_v13, %v562_v43 }
 0x106   : > { %v534_v62 = vpop.permute.xlu1 %533 }
 0x107   : > { %v714_v31 = vmin.f32 %v534_v62, %v709_v23  ;;  %v715_v19 = vmin.f32 %v534_v62, %v713_v24  ;;  %v581_v38 = vpop.permute.xlu0 %580  ;;  %v536_v46 = vsub.f32 %v534_v62, %v1732_v10  ;;  %v537_v47 = vsub.f32 %v534_v62, %v1734_v30 }
 0x108   : > { %v602_v18 = vsub.f32 %v581_v38, %v1752_v32  ;;  %v603_v51 = vsub.f32 %v581_v38, %v1755_v33  ;;  %v606_v4 = vadd.f32 %v1752_v32, %v581_v38  ;;  %v607_v21 = vadd.f32 %v1755_v33, %v581_v38 }
 0x109   : > { %vm726_vm15 = vcmp.lt.f32.partialorder %v692_v34, %v714_v31  ;;  %vm727_vm0 = vcmp.lt.f32.partialorder %v693_v35, %v715_v19  ;;  %v736_v54 = vsub.f32 %v714_v31, %v692_v34  ;;  %v737_v55 = vsub.f32 %v715_v19, %v693_v35 }
 0x10a   : > { %v604_v17 = vsub.f32 %v1732_v10, %v602_v18  ;;  %v605_v42 = vsub.f32 %v1734_v30, %v603_v51  ;;  %v609_v31 = vsub.f32 %v607_v21, %v1734_v30 }
 0x10b   : > { %v565_v48 = vpop.permute.xlu1 %564 }
 0x10c   : > { %v567_v49 = vsub.f32 %v565_v48, %v1736_v12  ;;  %v568_v1 = vsub.f32 %v565_v48, %v1738_v16  ;;  %v724_v3 = vmin.f32 %v565_v48, %v719_v63  ;;  %v725_v50 = vmin.f32 %v565_v48, %v723_v61 }
 0x10d   : > { %v608_v63 = vsub.f32 %v606_v4, %v1732_v10 }
 0x10e   : > { %v571_v52 = vmin.f32 %v536_v46, %v567_v49  ;;  %v572_v53 = vmin.f32 %v537_v47, %v568_v1  ;;  %vm728_vm1 = vcmp.lt.f32.partialorder %v702_v36, %v724_v3  ;;  %vm729_vm2 = vcmp.lt.f32.partialorder %v703_v37, %v725_v50 }
 0x10f   : > { %v738_v11 = vsub.f32 %v724_v3, %v702_v36  ;;  %v739_v56 = vsub.f32 %v725_v50, %v703_v37  ;;  %vm730_vm3 = vmand %vm726_vm15, %vm728_vm1 }
 0x110   : > { %v573_v57 = vmin.f32 %v569_v39, %v571_v52  ;;  %v574_v58 = vmin.f32 %v570_v44, %v572_v53  ;;  %v759_v59 = vpop.permute.xlu1 %758  ;;  %vm731_vm4 = vmand %vm727_vm0, %vm729_vm2  ;;  %v1383_v14 = vsel %vm730_vm3, 1.0, %v1505_v60  ;;  %v945_v53 = vsel %vm944_vm9, %v1712_v0, 0.0 }
 0x111   : > { %v1384_v15 = vsel %vm731_vm4, 1.0, %v1505_v60  ;;  %v740_v5 = vmul.f32 %v738_v11, %v736_v54  ;;  %v741_v6 = vmul.f32 %v739_v56, %v737_v55  ;;  %v769_v8 = vadd.f32 %v764_v7, %v759_v59 }
 0x112   : > { %vm575_vm5 = vcmp.gt.f32.partialorder %v573_v57, 0.0  ;;  %vm576_vm6 = vcmp.gt.f32.partialorder %v574_v58, 0.0  ;;  %v770_v20 = vadd.f32 %v768_v29, %v759_v59  ;;  %v952_v57 = vsel %vm944_vm9, %v1714_v45, 0.0 }
 0x113   : > { %v742_v22 = vmul.f32 %v1383_v14, %v740_v5  ;;  %v743_v40 = vmul.f32 %v1384_v15, %v741_v6  ;;  %v1769_v23 = vsel %vm575_vm5, 1.0, %v1505_v60  ;;  %v1772_v24 = vsel %vm576_vm6, 1.0, %v1505_v60 }
 0x114   : > { %v638_v25 = vrot.slane %v1769_v23, 4  ;;  %v644_v28 = vrot.slane %v1772_v24, 4  ;;  %v1506_v58 = vmov 1966171168   ;;  %v946_v15 = vrot.slane %v945_v53, 4 }
 0x115   : > { %v771_v26 = vsub.f32 %v769_v8, %v742_v22  ;;  %v772_v27 = vsub.f32 %v770_v20, %v743_v40  ;;  %v612_v62 = vpop.permute.xlu1 %611  ;;  %v1069_v59 = vunpack.c.l.s4 %v1506_v58  ;;  %vm1085_vm0 = vcmp.lt.s32.totalorder %v455_v2, 256 }
 0x116   : > { %v614_v13 = vsub.f32 %v612_v62, %v1752_v32  ;;  %v615_v41 = vsub.f32 %v612_v62, %v1755_v33  ;;  %v618_v43 = vadd.f32 %v612_v62, %v1752_v32  ;;  %v619_v61 = vadd.f32 %v612_v62, %v1755_v33 }
 0x117   : > { %v773_v7 = vadd.f32 1e-16, %v771_v26  ;;  %v774_v29 = vadd.f32 1e-16, %v772_v27  ;;  %v639_v19 = vadd.f32 %v1769_v23, %v638_v25  ;;  %v645_v37 = vadd.f32 %v1772_v24, %v644_v28 }
 0x118   : > { %v616_v34 = vsub.f32 %v1736_v12, %v614_v13  ;;  %v617_v10 = vsub.f32 %v1738_v16, %v615_v41  ;;  %v620_v35 = vsub.f32 %v618_v43, %v1736_v12  ;;  %v621_v36 = vsub.f32 %v619_v61, %v1738_v16 }
 0x119   : > { %1468 = vrcp.f32 %v773_v7  ;;  %v640_v44 = vrot.slane %v639_v19, 2  ;;  %v646_v47 = vrot.slane %v645_v37, 2  ;;  %v1070_v27 = vunpack.c.0.s8 %v1069_v59 }
 0x11a   : > { %1470 = vrcp.f32 %v774_v29  ;;  %v622_v32 = vmin.f32 %v604_v17, %v616_v34  ;;  %v623_v33 = vmin.f32 %v605_v42, %v617_v10  ;;  %v624_v38 = vmin.f32 %v608_v63, %v620_v35 }
 0x11b   : > { %v625_v39 = vmin.f32 %v609_v31, %v621_v36  ;;  %v641_v12 = vadd.f32 %v640_v44, %v639_v19  ;;  %v647_v1 = vadd.f32 %v646_v47, %v645_v37  ;;  %v953_v42 = vrot.slane %v952_v57, 4 }
 0x11c   : > { %v626_v30 = vmin.f32 %v622_v32, %v624_v38  ;;  %v947_v45 = vadd.f32 %v946_v15, %v945_v53  ;;  %v1073_v63 = vsub.s32 %v1070_v27, %v1585_v9 }
 0x11d   : > { %v627_v46 = vmin.f32 %v623_v33, %v625_v39  ;;  %v642_v51 = vrot.slane %v641_v12, 1  ;;  %v648_v54 = vrot.slane %v647_v1, 1 }
 0x11e   : > { %vm628_vm7 = vcmp.gt.f32.partialorder %v626_v30, 0.0  ;;  %v948_v28 = vrot.slane %v947_v45, 2 }
 0x11f   : > { %vm629_vm8 = vcmp.gt.f32.partialorder %v627_v46, 0.0  ;;  %v1791_v48 = vsel %vm628_vm7, 1.0, %v1505_v60  ;;  %v643_v8 = vadd.f32 %v642_v51, %v641_v12  ;;  %v649_v21 = vadd.f32 %v648_v54, %v647_v1 }
 0x120   : > { %v652_v16 = vrot.slane %v1791_v48, 4  ;;  %v1795_v49 = vsel %vm629_vm8, 1.0, %v1505_v60  ;;  %v949_v7 = vadd.f32 %v948_v28, %v947_v45  ;;  %v672_v36 = vmul.f32 %v1791_v48, %v1769_v23 }
 0x121   : > { %v658_v3 = vrot.slane %v1795_v49, 4  ;;  %vm650_vm10 = vcmp.gt.f32.partialorder %v643_v8, 0.0  ;;  %vm651_vm13 = vcmp.gt.f32.partialorder %v649_v21, 0.0  ;;  %v673_v39 = vmul.f32 %v1795_v49, %v1772_v24 }
 0x122   : > { %v653_v50 = vadd.f32 %v1791_v48, %v652_v16  ;;  %v950_v19 = vrot.slane %v949_v7, 1  ;;  %v1049_v2 = vsub.f32 1.0, %v672_v36 }
 0x123   : > { %v659_v18 = vadd.f32 %v1795_v49, %v658_v3  ;;  %v1050_v1 = vsub.f32 1.0, %v673_v39 }
 0x124   : > { %v654_v52 = vrot.slane %v653_v50, 2  ;;  %v1051_v3 = vmul.f32 100000.0, %v1049_v2 }
 0x125   : > { %v660_v55 = vrot.slane %v659_v18, 2  ;;  %v1052_v24 = vmul.f32 100000.0, %v1050_v1 }
 0x126   : > { %v1469_v11 = vpop.eup %1468  ;;  %v655_v56 = vadd.f32 %v654_v52, %v653_v50 }
 0x127   : > { %v1471_v14 = vpop.eup %1470  ;;  %v777_v4 = vmul.f32 %v1469_v11, %v742_v22  ;;  %v661_v5 = vadd.f32 %v660_v55, %v659_v18  ;;  %v954_v22 = vadd.f32 %v953_v42, %v952_v57 }
 0x128   : > { %v778_v6 = vmul.f32 %v1471_v14, %v743_v40  ;;  %v656_v0 = vrot.slane %v655_v56, 1 }
 0x129   : > { %1063 = vst [vmem:[%s431_s30] sm:$0xff] %v777_v4  ;;  %v1037_v20 = vadd.f32 1e-08, %v777_v4  ;;  %v662_v17 = vrot.slane %v661_v5, 1  ;;  %v955_v43 = vrot.slane %v954_v22, 2 }
 0x12a   : > { %1064 = vst [vmem:[%s431_s30 + $0x8] sm:$0xff] %v778_v6  ;;  %v657_v25 = vadd.f32 %v656_v0, %v655_v56  ;;  %v1038_v26 = vadd.f32 1e-08, %v778_v6 }
 0x12b   : > { %1472 = vlog2.f32 %v1037_v20  ;;  %v663_v62 = vadd.f32 %v662_v17, %v661_v5  ;;  %v956_v31 = vadd.f32 %v955_v43, %v954_v22 }
 0x12c   : > { %vm664_vm11 = vcmp.gt.f32.partialorder %v657_v25, 0.0  ;;  %1474 = vlog2.f32 %v1038_v26 }
 0x12d   : > { %vm666_vm12 = vmor %vm650_vm10, %vm664_vm11  ;;  %vm665_vm14 = vcmp.gt.f32.partialorder %v663_v62, 0.0  ;;  %v957_v10 = vrot.slane %v956_v31, 1 }
 0x12e   : > { %v1381_v40 = vsel %vm666_vm12, 1.0, %v1505_v60  ;;  %vm667_vm15 = vmor %vm651_vm13, %vm665_vm14 }
 0x12f   : > { %v1382_v13 = vsel %vm667_vm15, 1.0, %v1505_v60  ;;  %v951_v60 = vadd.f32 %v950_v19, %v949_v7  ;;  %v958_v32 = vadd.f32 %v957_v10, %v956_v31  ;;  %v1055_v16 = vsub.f32 1.0, %v1381_v40 }
 0x130   : > { %v1067_v41 = vcombine.low %v1381_v40, %v1382_v13  ;;  %v1056_v51 = vsub.f32 1.0, %v1382_v13 }
 0x131   : > { %v959_v38 = vsub.f32 0.0, %v951_v60  ;;  %v960_v44 = vsub.f32 0.0, %v958_v32  ;;  %v1057_v54 = vmul.f32 1e+09, %v1055_v16 }
 0x132   : > { %v1074_v61 = vrot.slane %v1067_v41, %v1073_v63  ;;  %v1058_v57 = vmul.f32 1e+09, %v1056_v51 }
 0x134   : > { %v1081_v29 = vrot.slane %v1074_v61, %v1073_v63 }
 0x136   : > { %1087 = vst.msk [vmem:[%s440_s11] sm:$0x3] %vm1085_vm0, %v1081_v29 }
 0x138   : > { %v1473_v34 = vpop.eup %1472 }
 0x139   : > { %v1040_v9 = vmul.f32 0.6931472, %v1473_v34  ;;  %v1475_v35 = vpop.eup %1474 }
 0x13a   : > { %v1042_v33 = vmul.f32 0.6931472, %v1475_v35 }
 0x13b   : > { %v1043_v37 = vsub.f32 0.0, %v1040_v9 }
 0x13c   : > { %v1044_v46 = vsub.f32 0.0, %v1042_v33 }
 0x13d   : > { %v1045_v30 = vmul.f32 3.0, %v1043_v37 }
 0x13e   : > { %v1046_v48 = vmul.f32 3.0, %v1044_v46 }
 0x13f   : > { %v1028_v47 = vpop.f32.mrf.mxu0 }
 0x140   : > { %v1035_v12 = vsub.f32 %v959_v38, %v1028_v47 }
 0x141   : > { %v1030_v50 = vpop.f32.mrf.mxu0 }
 0x142   : > { %v1047_v18 = vadd.f32 %v1045_v30, %v1035_v12  ;;  %v1036_v23 = vsub.f32 %v960_v44, %v1030_v50 }
 0x143   : > { %v1032_v52 = vpop.f32.mrf.mxu0 }
 0x144   : > { %v1053_v53 = vadd.f32 %v1051_v3, %v1047_v18  ;;  %v1048_v55 = vadd.f32 %v1046_v48, %v1036_v23 }
 0x145   : > { %v1033_v49 = vpop.f32.mrf.mxu0 }
 0x146   : > { %v1059_v11 = vadd.f32 %v1057_v54, %v1053_v53  ;;  %v1054_v56 = vadd.f32 %v1052_v24, %v1048_v55 }
 0x148   : > { %1061 = vst [vmem:[%s421_s14] sm:$0xff] %v1059_v11  ;;  %v1060_v58 = vadd.f32 %v1058_v57, %v1054_v56 }
 0x14a   : > { %1062 = vst [vmem:[%s421_s14 + $0x8] sm:$0xff] %v1060_v58 }
 0x14b PF: > { %s18_s26 = sadd.s32 1, %s1498_s26   ;;  %s1850_s24 = smov %s1494_s25 }
 0x14c   : > { %p15_p5 = scmp.ge.s32.totalorder %s18_s26, 4   ;;  %s1851_s25 = smov %s1853_s27 }
 0x14e   :  { %17 = sbr.rel (!%p15_p5) target bundleno = 2 (0x2), region = 111 }

// kernel: loss_fn.3
= control target key start
LH: loop header
LB: loop body
LE: loop exit
PB: predicated region body
PF: predicated region fallthrough
CT: control target
= control target key end

     0   :  { %s1182_s27 = smov 0   ;;  %s1184_s28 = smov 0   ;;  %s1343_s0 = inlined_call_operand.vmem [shape: f32[2,9,256], index: 0, kind: input, shape index: {}]   ;;  %s1344_s1 = inlined_call_operand.vmem [shape: f32[2,4,256], index: 1, kind: input, shape index: {}]   ;;  %s1345_s2 = inlined_call_operand.vmem [shape: f32[2,4,256], index: 2, kind: input, shape index: {}]   ;;  %s1346_s3 = inlined_call_operand.vmem [shape: f32[2,4,256], index: 3, kind: input, shape index: {}]   ;;  %s1347_s4 = inlined_call_operand.vmem [shape: f32[2,1,256], index: 4, kind: input, shape index: {}]   ;;  %s1348_s5 = inlined_call_operand.vmem [shape: f32[1,256], index: 5, kind: input, shape index: {}]   ;;  %s1349_s6 = inlined_call_operand.vmem [shape: f32[2,1,1], index: 6, kind: output, shape index: {0}]   ;;  %s1350_s7 = inlined_call_operand.vmem [shape: f32[2,1,1], index: 7, kind: output, shape index: {1}]   ;;  %s1351_s8 = inlined_call_operand.vmem [shape: f32[2,1,1], index: 8, kind: output, shape index: {2}]  }
   0x1   :  { %s1186_s29 = smov 0  }
   0x2 LB: > { %s31_s30 = sadd.s32 1, %s1127_s28  ;;  %p1034_p0 = scmp.ge.s32.totalorder %s1131_s29, 1  ;;  %s1131_s29 = sphi %s1186_s29, %s19_s29   ;;  %s1127_s28 = sphi %s1184_s28, %s1357_s28   ;;  %s1123_s27 = sphi %s1182_s27, %s1356_s27  }
   0x3   : > { %p33_p1 = scmp.ge.s32.totalorder %s31_s30, 2  ;;  %p363_p2 = scmp.lt.s32.totalorder %s1131_s29, 3 }
   0x5   : > { %s1359_s30 = smov (%p33_p1, %s31_s30), 0  ;;  %p364_p3 = pnand %p1034_p0, %p363_p2 }
   0x6   : > { %p445_p4 = scmp.lt.s32.totalorder (!%p364_p3), %s1123_s27, 1 }
   0x7   : > { %367 = sbr.rel (%p364_p3) target bundleno = 293 (0x125), region = 44 }
   0xc   : > { %v511_v0 = vlaneseq  ;;  %s1361_s27 = smov (!%p445_p4, %s1123_s27), 1  ;;  %v1133_v2 = vmov 0.0   ;;  %v1134_v32 = vmov 0   ;;  %v1135_v53 = vmov 286326784  }
   0xd   : > { %s1053_s9 = sshll.u32 %s1361_s27, 5  ;;  %s1213_s10 = sshll.u32 %s1361_s27, 3  ;;  %v585_v54 = vunpack.c.l.s4 %v1135_v53  ;;  %v1136_v57 = vmov 1966171168   ;;  %vm750_vm8 = vcmask 1042432   ;;  %vm751_vm9 = vcmask 1046532  }
   0xe   : > { %vm1203_vm0 = vcmp.lt.s32.totalorder %v511_v0, 256  ;;  %s452_s13 = scalar_lea.vmem %s1343_s0, %s1053_s9  ;;  %s462_s16 = scalar_lea.vmem %s1344_s1, %s1213_s10  ;;  %v588_v48 = vshrl.u32 %v511_v0, 7  ;;  %v595_v58 = vunpack.c.l.s4 %v1136_v57  ;;  %vm752_vm10 = vmor %vm750_vm8, %vm751_vm9  ;;  %vm821_vm11 = vcmask 1043456  }
   0xf   : > { %515 = vst.msk [vmem:[#allocation2] sm:$0x3] %vm1203_vm0, %v1133_v2  ;;  %516 = vst.msk [vmem:[#allocation3] sm:$0x3] %vm1203_vm0, %v1133_v2  ;;  %s472_s19 = scalar_lea.vmem %s1345_s2, %s1213_s10  ;;  %v1226_v3 = vld [vmem:[%s452_s13] sm:$0xff]  ;;  %v1228_v6 = vld [vmem:[%s452_s13 + $0x8] sm:$0xff]  ;;  %s482_s23 = scalar_lea.vmem %s1346_s3, %s1213_s10  ;;  %v586_v62 = vunpack.c.0.s8 %v585_v54 }
  0x10   : > { %v522_v4 = vld [vmem:[%s462_s16] sm:$0xff]  ;;  %v632_v9 = vand.u32 2147483647, %v1226_v3  ;;  %v633_v12 = vand.u32 2147483647, %v1228_v6  ;;  %s1043_s20 = sshll.u32 %s1361_s27, 1  ;;  %s503_s17 = scalar_lea.vmem %s1350_s7, %s1361_s27 }
  0x11   : > { %v523_v5 = vld [vmem:[%s472_s19] sm:$0xff]  ;;  %v527_v7 = vmul.f32 0.5, %v522_v4  ;;  %v1232_v16 = vld [vmem:[%s452_s13 + $0x10] sm:$0x1]  ;;  %v1234_v18 = vld [vmem:[%s452_s13 + $0x18] sm:$0x1]  ;;  %s491_s26 = scalar_lea.vmem %s1347_s4, %s1043_s20  ;;  %s500_s13 = scalar_lea.vmem %s1349_s6, %s1361_s27 }
  0x12   : > { %v533_v8 = vmul.f32 0.5, %v523_v5  ;;  %v634_v15 = vsub.f32 0.0, %v632_v9  ;;  %v635_v17 = vsub.f32 0.0, %v633_v12  ;;  %v710_v27 = vand.u32 2147483647, %v1232_v16  ;;  %v524_v56 = vld [vmem:[%s482_s23] sm:$0xff]  ;;  %s506_s21 = scalar_lea.vmem %s1351_s8, %s1361_s27 }
  0x13   : > { %v529_v10 = vrot.slane %v527_v7, 6  ;;  %v1047_v28 = vrot.slane %v522_v4, 9  ;;  %v1048_v29 = vrot.slane %v523_v5, 9  ;;  %v711_v30 = vand.u32 2147483647, %v1234_v18 }
  0x14   : > { %v535_v11 = vrot.slane %v533_v8, 6  ;;  %v636_v23 = vmul.f32 1.442695, %v634_v15  ;;  %v638_v24 = vmul.f32 1.442695, %v635_v17  ;;  %v712_v36 = vsub.f32 0.0, %v710_v27 }
  0x15   : > { %v530_v13 = vrot.slane %v529_v10, 4  ;;  %v562_v37 = vmul.f32 %v1047_v28, %v522_v4  ;;  %v567_v38 = vmul.f32 %v1048_v29, %v523_v5  ;;  %v713_v39 = vsub.f32 0.0, %v711_v30  ;;  %v1252_v60 = vld [vmem:[%s491_s26] sm:$0x3] }
  0x16   : > { %v536_v14 = vrot.slane %v535_v11, 4  ;;  %1091 = vpow2.f32 %v636_v23  ;;  %v714_v41 = vmul.f32 1.442695, %v712_v36  ;;  %v1250_v59 = vsub.s32 1, %v588_v48 }
  0x17   : > { %v532_v19 = vsub.f32 %v522_v4, %v530_v13  ;;  %v540_v21 = vadd.f32 %v530_v13, %v522_v4  ;;  %1093 = vpow2.f32 %v638_v24  ;;  %v716_v42 = vmul.f32 1.442695, %v713_v39  ;;  %v526_v13 = vld [vmem:[%s1348_s5] sm:$0x3] }
  0x18   : > { %v538_v20 = vsub.f32 %v523_v5, %v536_v14  ;;  %v541_v22 = vadd.f32 %v536_v14, %v523_v5  ;;  %1095 = vpow2.f32 %v714_v41  ;;  %v568_v45 = vadd.f32 %v567_v38, %v562_v37 }
  0x19   : > { %1097 = vpow2.f32 %v716_v42  ;;  %v1254_v61 = vsub.s32 0, %v588_v48  ;;  %v697_v63 = vcombine.high %v524_v56, %v524_v56  ;;  %v1260_v4 = vrot.slane %v1252_v60, %v1250_v59 }
  0x1a   : > { %v539_v25 = vmax.f32 %v532_v19, %v538_v20  ;;  %v542_v26 = vmin.f32 %v540_v21, %v541_v22  ;;  %v698_v9 = vrot.slane %v524_v56, 3  ;;  %v1273_v14 = vsub.s32 %v586_v62, %v588_v48 }
  0x1b   : > { %v1266_v7 = vrot.slane %v1252_v60, %v1254_v61  ;;  %v699_v15 = vrot.slane %v697_v63, 3  ;;  %v617_v19 = vmax.f32 %v1228_v6, 0.0  ;;  %v629_v20 = vmul.f32 %v1260_v4, %v1228_v6 }
  0x1c   : > { %vm543_vm1 = vcmp.lt.f32.partialorder %v539_v25, %v542_v26  ;;  %v551_v31 = vsub.f32 %v542_v26, %v539_v25  ;;  %v616_v21 = vmax.f32 %v1226_v3, 0.0  ;;  %v702_v24 = vmul.f32 %v698_v9, %v1226_v3 }
  0x1d   : > { %v544_v33 = vsel %vm543_vm1, 1, %v1134_v32  ;;  %v628_v22 = vmul.f32 %v1266_v7, %v1226_v3  ;;  %v664_v28 = vrot.slane %v526_v13, %v1254_v61  ;;  %v668_v29 = vrot.slane %v526_v13, %v1250_v59 }
  0x1e   : > { %v1044_v34 = vrot.slane %v544_v33, 9  ;;  %v1046_v35 = vrot.slane %v551_v31, 9  ;;  %v694_v30 = vmax.f32 %v1232_v16, 0.0  ;;  %v631_v33 = vsub.f32 %v617_v19, %v629_v20 }
  0x1f   : > { %v705_v38 = vmul.f32 %v699_v15, %v1234_v18  ;;  %v706_v39 = vsub.f32 %v616_v21, %v702_v24  ;;  %vm775_vm12 = vcmask 1040384   ;;  %vm789_vm13 = vcmask 0  }
  0x20   : > { %vm547_vm2 = vcmp.ne.s32.totalorder %v1044_v34, 0  ;;  %v556_v40 = vmul.f32 %v1046_v35, %v551_v31  ;;  %v703_v31 = vmul.f32 %v699_v15, %v1228_v6  ;;  %v695_v34 = vmax.f32 %v1234_v18, 0.0 }
  0x21   : > { %vm548_vm3 = vmand %vm543_vm1, %vm547_vm2  ;;  %v704_v35 = vmul.f32 %v698_v9, %v1232_v16  ;;  %v590_v18 = vrot.slane %v1252_v60, %v1273_v14 }
  0x22   : > { %v1045_v43 = vsel %vm548_vm3, 1.0, %v1133_v2  ;;  %v596_v2 = vunpack.c.0.s8 %v595_v58 }
  0x23   : > { %v1238_v44 = vmul.f32 %v1045_v43, %v556_v40  ;;  %v1092_v49 = vpop.eup %1091  ;;  %v630_v40 = vsub.f32 %v616_v21, %v628_v22  ;;  %v708_v54 = vsub.f32 %v694_v30, %v704_v35 }
  0x24   : > { %v1094_v50 = vpop.eup %1093  ;;  %v640_v52 = vadd.f32 1.0, %v1092_v49  ;;  %v643_v8 = vmul.f32 -0.5, %v1092_v49  ;;  %v1275_v17 = vsub.s32 %v596_v2, %v588_v48  ;;  %v646_v25 = vand.u32 2147483647, %v1092_v49 }
  0x25   : > { %v570_v46 = vrot.slane %v1238_v44, 6  ;;  %v649_v55 = vadd.f32 1.0, %v1094_v50  ;;  %v1256_v0 = vpop.eup %1095  ;;  %v652_v11 = vmul.f32 -0.5, %v1094_v50  ;;  %v655_v27 = vand.u32 2147483647, %v1094_v50 }
  0x26   : > { %v1262_v5 = vpop.eup %1097  ;;  %v718_v10 = vadd.f32 1.0, %v1256_v0  ;;  %v644_v23 = vadd.f32 1.0, %v643_v8  ;;  %v721_v32 = vmul.f32 -0.5, %v1256_v0  ;;  %vm647_vm4 = vcmp.lt.f32.partialorder %v646_v25, 0.0004427343 }
  0x27   : > { %v572_v47 = vsub.f32 %v568_v45, %v570_v46  ;;  %v727_v12 = vadd.f32 1.0, %v1262_v5  ;;  %v653_v26 = vadd.f32 1.0, %v652_v11  ;;  %v730_v3 = vmul.f32 -0.5, %v1262_v5 }
  0x28   : > { %v645_v37 = vmul.f32 %v1092_v49, %v644_v23  ;;  %vm656_vm5 = vcmp.lt.f32.partialorder %v655_v27, 0.0004427343  ;;  %v707_v46 = vsub.f32 %v617_v19, %v703_v31  ;;  %v724_v48 = vand.u32 2147483647, %v1256_v0 }
  0x29   : > { %v573_v51 = vadd.f32 1e-16, %v572_v47  ;;  %v654_v43 = vmul.f32 %v1094_v50, %v653_v26  ;;  %v722_v47 = vadd.f32 1.0, %v721_v32  ;;  %v733_v49 = vand.u32 2147483647, %v1262_v5 }
  0x2a   : > { %vm1299_vm6 = vcmp.lt.f32.partialorder %v724_v48, 0.0004427343 }
  0x2b   : > { %1099 = vrcp.f32 %v573_v51  ;;  %v723_v63 = vmul.f32 %v1256_v0, %v722_v47  ;;  %vm734_vm7 = vcmp.lt.f32.partialorder %v733_v49, 0.0004427343 }
  0x2c   : > { %1101 = vlog2.f32 %v640_v52  ;;  %v731_v52 = vadd.f32 1.0, %v730_v3 }
  0x2d   : > { %1103 = vlog2.f32 %v649_v55  ;;  %v709_v55 = vsub.f32 %v695_v34, %v705_v38 }
  0x2e   : > { %1105 = vlog2.f32 %v718_v10  ;;  %v732_v10 = vmul.f32 %v1262_v5, %v731_v52  ;;  %v580_v5 = vld [vmem:[#allocation2] sm:$0x3] }
  0x2f   : > { %1107 = vlog2.f32 %v727_v12 }
  0x38   : > { %v1100_v36 = vpop.eup %1099 }
  0x39   : > { %v1102_v41 = vpop.eup %1101  ;;  %v1049_v42 = vrot.slane %v1100_v36, 10 }
  0x3a   : > { %v1104_v6 = vpop.eup %1103  ;;  %v642_v45 = vmul.f32 0.6931472, %v1102_v41 }
  0x3b   : > { %v579_v16 = vmul.f32 %v1049_v42, %v1238_v44  ;;  %v651_v51 = vmul.f32 0.6931472, %v1104_v6  ;;  %v1106_v8 = vpop.eup %1105 }
  0x3c   : > { %v648_v53 = vsel %vm647_vm4, %v645_v37, %v642_v45  ;;  %v1108_v11 = vpop.eup %1107  ;;  %v720_v13 = vmul.f32 0.6931472, %v1106_v8 }
  0x3d   : > { %v581_v50 = vmul.f32 %v579_v16, %v579_v16  ;;  %v657_v56 = vsel %vm656_vm5, %v654_v43, %v651_v51  ;;  %v736_v57 = vadd.f32 %v706_v39, %v648_v53  ;;  %v658_v58 = vadd.f32 %v648_v53, %v630_v40 }
  0x3e   : > { %v659_v62 = vadd.f32 %v657_v56, %v631_v33  ;;  %v737_v44 = vadd.f32 %v707_v46, %v657_v56  ;;  %v729_v0 = vmul.f32 0.6931472, %v1108_v11  ;;  %v726_v20 = vsel %vm1299_vm6, %v723_v63, %v720_v13 }
  0x3f   : > { %v582_v9 = vsub.f32 1.0, %v581_v50  ;;  %v671_v60 = vmul.f32 %v664_v28, %v658_v58  ;;  %v740_v14 = vmul.f32 %v736_v57, %v1266_v7  ;;  %v738_v24 = vadd.f32 %v726_v20, %v708_v54 }
  0x40   : > { %v672_v12 = vmul.f32 %v668_v29, %v659_v62  ;;  %v741_v15 = vmul.f32 %v737_v44, %v1260_v4  ;;  %v735_v23 = vsel %vm734_vm7, %v732_v10, %v729_v0  ;;  %v615_v29 = vld [vmem:[#allocation3] sm:$0x3] }
  0x41   : > { %v592_v19 = vmul.f32 %v590_v18, %v582_v9  ;;  %v739_v25 = vadd.f32 %v735_v23, %v709_v55  ;;  %v742_v30 = vmul.f32 %v738_v24, %v1266_v7 }
  0x42   : > { %v675_v21 = vcombine.high %v671_v60, %v672_v12  ;;  %v748_v26 = vcombine.high %v740_v14, %v741_v15 }
  0x43   : > { %v600_v22 = vrot.slane %v592_v19, %v1275_v17  ;;  %v743_v31 = vmul.f32 %v739_v25, %v1260_v4 }
  0x44   : > { %v682_v27 = vrot.slane %v675_v21, %v1275_v17  ;;  %v1050_v35 = vrot.slane %v748_v26, 9 }
  0x45   : > { %v607_v28 = vrot.slane %v600_v22, %v1275_v17  ;;  %v749_v34 = vcombine.low %v742_v30, %v743_v31 }
  0x46   : > { %v689_v32 = vrot.slane %v682_v27, %v1275_v17 }
  0x47   : > { %v609_v33 = vadd.f32 %v607_v28, %v580_v5  ;;  %v755_v36 = vrot.slane %v749_v34, 5 }
  0x48   : > { %v691_v3 = vadd.f32 %v689_v32, %v615_v29 }
  0x49   : > { %614 = vst.msk [vmem:[#allocation2] sm:$0x3] %vm1203_vm0, %v609_v33  ;;  %v756_v7 = vsel %vm752_vm10, %v1050_v35, %v755_v36 }
  0x4a   : > { %692 = vst.msk [vmem:[#allocation3] sm:$0x3] %vm1203_vm0, %v691_v3  ;;  %v819_v37 = vcombine.high %v756_v7, %v756_v7  ;;  %v822_v4 = vsel %vm821_vm11, %v756_v7, 0.0 }
  0x4c   : > { %v823_v38 = vsel %vm821_vm11, %v819_v37, 0.0 }
  0x4d   : > { %v824_v39 = vadd.f32 %v823_v38, %v822_v4 }
  0x4f   : > { %825 = vadd.xlane.f32.xlu1 %v824_v39 }
  0x50   : > { %v763_v40 = vld [vmem:[#allocation2] sm:$0x3] }
  0x51   : > { %v768_v17 = vrot.slane %v763_v40, %v1254_v61  ;;  %v772_v41 = vrot.slane %v763_v40, %v1250_v59  ;;  %v791_v42 = vld [vmem:[#allocation3] sm:$0x3] }
  0x52   : > { %v796_v43 = vrot.slane %v791_v42, %v1254_v61  ;;  %v800_v6 = vrot.slane %v791_v42, %v1250_v59 }
  0x53   : > { %v776_v45 = vsel %vm775_vm12, %v768_v17, 0.0  ;;  %v777_v1 = vsel %vm775_vm12, %v772_v41, 0.0 }
  0x54   : > { %v778_v46 = vadd.f32 %v777_v1, %v776_v45  ;;  %v803_v47 = vsel %vm775_vm12, %v796_v43, 0.0  ;;  %v804_v48 = vsel %vm775_vm12, %v800_v6, 0.0 }
  0x55   : > { %v805_v16 = vadd.f32 %v804_v48, %v803_v47 }
  0x56   : > { %779 = vadd.xlane.f32.xlu0 %v778_v46 }
  0x5a   : > { %806 = vadd.xlane.f32.xlu0 %v805_v16 }
  0xd8   : > { %v826_v51 = vpop.xlane.xlu1 %825 }
  0xd9   : > { %v827_v52 = vrot.slane %v826_v51, 4 }
  0xdb   : > { %v828_v49 = vadd.f32 %v827_v52, %v826_v51 }
  0xdd   : > { %v829_v55 = vrot.slane %v828_v49, 2 }
  0xdf   : > { %v780_v18 = vpop.xlane.xlu0 %779  ;;  %v830_v58 = vadd.f32 %v829_v55, %v828_v49 }
  0xe0   : > { %v781_v53 = vrot.slane %v780_v18, 4 }
  0xe1   : > { %v831_v8 = vrot.slane %v830_v58, 1 }
  0xe2   : > { %v782_v54 = vadd.f32 %v781_v53, %v780_v18 }
  0xe3   : > { %v807_v50 = vpop.xlane.xlu0 %806  ;;  %v832_v60 = vadd.f32 %v831_v8, %v830_v58 }
  0xe4   : > { %v783_v56 = vrot.slane %v782_v54, 2  ;;  %v808_v61 = vrot.slane %v807_v50, 4 }
  0xe6   : > { %v809_v59 = vadd.f32 %v808_v61, %v807_v50  ;;  %v784_v57 = vadd.f32 %v783_v56, %v782_v54 }
  0xe8   : > { %v810_v62 = vrot.slane %v809_v59, 2  ;;  %v785_v63 = vrot.slane %v784_v57, 1 }
  0xea   : > { %v811_v2 = vadd.f32 %v810_v62, %v809_v59  ;;  %v786_v44 = vadd.f32 %v785_v63, %v784_v57 }
  0xec   : > { %1057 = vpush %v786_v44  ;;  %v812_v9 = vrot.slane %v811_v2, 1 }
  0xee   : > { %v813_v10 = vadd.f32 %v812_v9, %v811_v2 }
  0xf0   : > { %1059 = vpush %v813_v10 }
  0xf1   : > { %1061 = vpush %v832_v60 }
 0x11d   : > { %s1058_s14 = spop %1057 }
 0x11e   : > { %v788_v11 = vstv %s1058_s14 }
 0x11f   : > { %790 = vst.msk [vmem:[%s500_s13] sm:$0x1] %vm789_vm13, %v788_v11 }
 0x121   : > { %s1060_s18 = spop %1059 }
 0x122   : > { %v815_v12 = vstv %s1060_s18  ;;  %s1062_s22 = spop %1061 }
 0x123   : > { %816 = vst.msk [vmem:[%s503_s17] sm:$0x1] %vm789_vm13, %v815_v12  ;;  %v834_v13 = vstv %s1062_s22 }
 0x124   : > { %835 = vst.msk [vmem:[%s506_s21] sm:$0x1] %vm789_vm13, %v834_v13 }
 0x125 PF: > { %s19_s29 = sadd.s32 1, %s1131_s29   ;;  %s1356_s27 = smov %s1127_s28 }
 0x126   : > { %p16_p5 = scmp.ge.s32.totalorder %s19_s29, 4   ;;  %s1357_s28 = smov %s1359_s30 }
 0x128   :  { %18 = sbr.rel (!%p16_p5) target bundleno = 2 (0x2), region = 121 }

</bundles_post_ra>
